<compile_context>
chip_gen: v5e
topology: v5e:2x2
jax: 0.10.0
libtpu: 0.0.40
codegen_flags: <defaults>
</compile_context>

<pallas_src>
import jax
import jax.numpy as jnp
from jax.experimental import pallas as pl
from jax.experimental.pallas import tpu as pltpu

F_IN = 16      # predict_set.num_node_features (synthetic choice)
HIDDEN = 40    # SAGEConv(F_IN, 40)
F_OUT = 24     # SAGEConv(40, 24)

H_PAD = 128    # lane-dense hidden width  (pad cols of W1/b1 are zero)
O_PAD = 128    # lane-dense output width  (pad lanes masked before log_softmax)

_MIB = 1024 * 1024


def _round_up(a, b):
    return ((a + b - 1) // b) * b


def _vmem_limit_bytes():
    """~48 MiB on v7x (64 MiB physical/TC), ~96 MiB on v5e/v6e (128 MiB)."""
    try:
        cap = pltpu.get_tpu_info().vmem_capacity_bytes
    except Exception:
        cap = 64 * _MIB
    return int(min(96 * _MIB, cap * 3 // 4))


def _choose_tiles(n, tile):
    """Pick (n_pad, tm, tk, fused) with tm | n_pad and tk | n_pad (all *128)."""
    blk = 128
    n_pad = _round_up(max(n, 8), blk)
    if n_pad <= min(tile, 256):
        return n_pad, n_pad, n_pad, True          # single fused two-layer kernel
    m = n_pad // blk
    max_bt = max(1, tile // blk)
    # reduction-axis (k) tile: largest divisor of m within the tile cap
    kt = max(d for d in range(1, min(m, max_bt) + 1) if m % d == 0)
    # row-axis (i) tile: same, but keep >= 2 row blocks (v7x megacore) if possible
    cap = min(max_bt, m // 2) if m >= 2 else max_bt
    it = max(d for d in range(1, max(cap, 1) + 1) if m % d == 0)
    return n_pad, it * blk, kt * blk, False


def _masked_log_softmax(logits):
    """log_softmax over feature lanes with padded lanes (>= F_OUT) masked out."""
    lane = jax.lax.broadcasted_iota(jnp.int32, logits.shape, 1)
    logits = jnp.where(lane < F_OUT, logits, jnp.float32(-1e30))
    m = jnp.max(logits, axis=1, keepdims=True)
    s = logits - m
    return s - jnp.log(jnp.sum(jnp.exp(s), axis=1, keepdims=True))


# ---------------------------------------------------------------------------
# Kernels
# ---------------------------------------------------------------------------
def sage1_kernel(a_ref, xk_ref, xi_ref, invd_ref, w1l_ref, w1r_ref, b1_ref,
                 h1_ref, acc_ref):
    """SAGEConv(F_IN -> HIDDEN) + ReLU for one (row_block, A_col_block) cell."""
    k = pl.program_id(1)

    @pl.when(k == 0)
    def _():
        acc_ref[...] = jnp.zeros_like(acc_ref)

    # int8 A upcast to bf16 + bf16 x tile -> native bf16 MXU matmul, f32 acc.
    acc_ref[...] += jnp.dot(a_ref[...].astype(jnp.bfloat16),
                            xk_ref[...].astype(jnp.bfloat16),
                            preferred_element_type=jnp.float32)

    @pl.when(k == pl.num_programs(1) - 1)
    def _():
        aggr = acc_ref[...] * invd_ref[...]        # mean aggregation (1/deg)
        # Epilogue matmuls stay f32 (once per row block, not per k step).
        h = (jnp.dot(aggr, w1l_ref[...], preferred_element_type=jnp.float32)
             + jnp.dot(xi_ref[...], w1r_ref[...], preferred_element_type=jnp.float32)
             + b1_ref[...])
        # ReLU; F.dropout(p=0.5, training=False) is identity in eval mode.
        h1_ref[...] = jnp.maximum(h, 0.0).astype(h1_ref.dtype)


def sage2_kernel(a_ref, hk_ref, hi_ref, invd_ref, w2l_ref, w2r_ref, b2_ref,
                 out_ref, acc_ref):
    """SAGEConv(HIDDEN -> F_OUT) + masked log_softmax over feature lanes."""
    k = pl.program_id(1)

    @pl.when(k == 0)
    def _():
        acc_ref[...] = jnp.zeros_like(acc_ref)

    # bf16 h1 stream x bf16 A tile -> bf16 MXU matmul, f32 accumulator.
    acc_ref[...] += jnp.dot(a_ref[...].astype(jnp.bfloat16), hk_ref[...],
                            preferred_element_type=jnp.float32)

    @pl.when(k == pl.num_programs(1) - 1)
    def _():
        aggr = acc_ref[...] * invd_ref[...]
        logits = (jnp.dot(aggr, w2l_ref[...], preferred_element_type=jnp.float32)
                  + jnp.dot(hi_ref[...].astype(jnp.float32), w2r_ref[...],
                            preferred_element_type=jnp.float32)
                  + b2_ref[...])
        out_ref[...] = _masked_log_softmax(logits)


def fused_kernel(a_ref, x_ref, invd_ref, w1l_ref, w1r_ref, b1_ref,
                 w2l_ref, w2r_ref, b2_ref, out_ref):
    """Both SAGE layers for a single-block graph; h1 never leaves VMEM."""
    a_bf = a_ref[...].astype(jnp.bfloat16)
    x = x_ref[...]
    invd = invd_ref[...]

    aggr1 = jnp.dot(a_bf, x.astype(jnp.bfloat16),
                    preferred_element_type=jnp.float32) * invd
    h1 = jnp.maximum(
        jnp.dot(aggr1, w1l_ref[...], preferred_element_type=jnp.float32)
        + jnp.dot(x, w1r_ref[...], preferred_element_type=jnp.float32)
        + b1_ref[...], 0.0)

    aggr2 = jnp.dot(a_bf, h1.astype(jnp.bfloat16),
                    preferred_element_type=jnp.float32) * invd
    logits = (jnp.dot(aggr2, w2l_ref[...], preferred_element_type=jnp.float32)
              + jnp.dot(h1, w2r_ref[...], preferred_element_type=jnp.float32)
              + b2_ref[...])
    out_ref[...] = _masked_log_softmax(logits)


# ---------------------------------------------------------------------------
# Wrapper
# ---------------------------------------------------------------------------
def _pad_params(params):
    w1l = jnp.zeros((F_IN, H_PAD), jnp.float32).at[:, :HIDDEN].set(params["w1l"])
    w1r = jnp.zeros((F_IN, H_PAD), jnp.float32).at[:, :HIDDEN].set(params["w1r"])
    b1 = jnp.zeros((1, H_PAD), jnp.float32).at[:, :HIDDEN].set(params["b1"])
    w2l = jnp.zeros((H_PAD, O_PAD), jnp.float32).at[:HIDDEN, :F_OUT].set(params["w2l"])
    w2r = jnp.zeros((H_PAD, O_PAD), jnp.float32).at[:HIDDEN, :F_OUT].set(params["w2r"])
    b2 = jnp.zeros((1, O_PAD), jnp.float32).at[:, :F_OUT].set(params["b2"])
    return w1l, w1r, b1, w2l, w2r, b2


def gsgnet_forward(x, edge_index, params, *, tile=2048):
    """Full GSGNet forward. `tile` is the node-block edge (multiple of 128)."""
    assert tile % 128 == 0 and tile >= 128
    n = x.shape[0]
    n_pad, tm, tk, fused = _choose_tiles(n, tile)

    # --- graph operands (dense adjacency path) ---
    src, tgt = edge_index[0], edge_index[1]
    # Adjacency as small-int edge counts; int8 halves the dominant N^2 HBM
    # stream (0/1/small counts are exact).  Degree via an O(E) segment-sum.
    # TODO(synk): scatter directly into int8 (skips the int32 intermediate and
    # most of the one-time setup traffic) once s8 scatter-add lowering is
    # verified on every TPU generation.
    a_i8 = (jnp.zeros((n_pad, n_pad), jnp.int32)
            .at[tgt, src].add(1)).astype(jnp.int8)      # edge multiplicity < 128
    deg = jnp.zeros((n_pad, 1), jnp.float32).at[tgt, 0].add(1.0)
    inv_deg = 1.0 / jnp.maximum(deg, 1.0)               # isolated nodes -> 0 aggr

    x_pad = jnp.zeros((n_pad, F_IN), jnp.float32).at[:n].set(x)
    w1l, w1r, b1, w2l, w2r, b2 = _pad_params(params)

    vmem_limit = _vmem_limit_bytes()

    # --------------------------- fused small-N path -------------------------
    if fused:
        cost_f = pl.CostEstimate(
            flops=2 * n_pad * n_pad * (F_IN + H_PAD)
            + 4 * n_pad * (F_IN * H_PAD + H_PAD * O_PAD),
            transcendentals=n_pad * O_PAD,
            bytes_accessed=n_pad * n_pad + n_pad * (F_IN + O_PAD + 1) * 4,
        )
        out_pad = pl.pallas_call(
            fused_kernel,
            out_shape=jax.ShapeDtypeStruct((n_pad, O_PAD), jnp.float32),
            grid_spec=pltpu.PrefetchScalarGridSpec(
                num_scalar_prefetch=0,
                grid=(1,),
                in_specs=[
                    pl.BlockSpec((n_pad, n_pad), lambda i: (0, 0)),   # A (int8)
                    pl.BlockSpec((n_pad, F_IN), lambda i: (0, 0)),    # x
                    pl.BlockSpec((n_pad, 1), lambda i: (0, 0)),       # 1/deg
                    pl.BlockSpec((F_IN, H_PAD), lambda i: (0, 0)),    # W1_l
                    pl.BlockSpec((F_IN, H_PAD), lambda i: (0, 0)),    # W1_r
                    pl.BlockSpec((1, H_PAD), lambda i: (0, 0)),       # b1
                    pl.BlockSpec((H_PAD, O_PAD), lambda i: (0, 0)),   # W2_l
                    pl.BlockSpec((H_PAD, O_PAD), lambda i: (0, 0)),   # W2_r
                    pl.BlockSpec((1, O_PAD), lambda i: (0, 0)),       # b2
                ],
                out_specs=pl.BlockSpec((n_pad, O_PAD), lambda i: (0, 0)),
            ),
            compiler_params=pltpu.CompilerParams(
                dimension_semantics=("arbitrary",),
                vmem_limit_bytes=vmem_limit),
            cost_estimate=cost_f,
        )(a_i8, x_pad, inv_deg, w1l, w1r, b1, w2l, w2r, b2)
        return out_pad[:n, :F_OUT]

    # ----------------------------- gridded path -----------------------------
    grid = (n_pad // tm, n_pad // tk)
    cparams = pltpu.CompilerParams(
        dimension_semantics=("parallel", "arbitrary"),   # rows across TCs (v7x)
        vmem_limit_bytes=vmem_limit,
    )
    # Dominant HBM stream: triple-buffer so the k==last epilogue bubble is hidden.
    a_spec = pl.BlockSpec((tm, tk), lambda i, k: (i, k),
                          pipeline_mode=pl.Buffered(3))

    # --- layer 1: SAGEConv(F_IN -> HIDDEN) + ReLU ---
    cost1 = pl.CostEstimate(
        flops=2 * n_pad * n_pad * F_IN + 4 * n_pad * F_IN * H_PAD,
        transcendentals=0,
        bytes_accessed=n_pad * n_pad
        + (n_pad // tm) * n_pad * F_IN * 4
        + n_pad * (F_IN * 4 + H_PAD * 2 + 4),
    )
    h1 = pl.pallas_call(
        sage1_kernel,
        out_shape=jax.ShapeDtypeStruct((n_pad, H_PAD), jnp.bfloat16),
        grid_spec=pltpu.PrefetchScalarGridSpec(
            num_scalar_prefetch=0,
            grid=grid,
            in_specs=[
                a_spec,                                              # A tile (int8)
                pl.BlockSpec((tk, F_IN), lambda i, k: (k, 0)),       # x (source rows)
                pl.BlockSpec((tm, F_IN), lambda i, k: (i, 0)),       # x (root rows)
                pl.BlockSpec((tm, 1), lambda i, k: (i, 0)),          # 1/deg
                pl.BlockSpec((F_IN, H_PAD), lambda i, k: (0, 0)),    # W1_l (resident)
                pl.BlockSpec((F_IN, H_PAD), lambda i, k: (0, 0)),    # W1_r (resident)
                pl.BlockSpec((1, H_PAD), lambda i, k: (0, 0)),       # b1   (resident)
            ],
            out_specs=pl.BlockSpec((tm, H_PAD), lambda i, k: (i, 0)),
            # TODO(synk): for tm >= 1024 stream x @ W1l instead of raw x so the
            # accumulator is lane-dense (128-wide) and the epilogue drops a matmul.
            scratch_shapes=[pltpu.VMEM((tm, F_IN), jnp.float32)],
        ),
        compiler_params=cparams,
        cost_estimate=cost1,
    )(a_i8, x_pad, x_pad, inv_deg, w1l, w1r, b1)

    # --- layer 2: SAGEConv(HIDDEN -> F_OUT) + log_softmax ---
    cost2 = pl.CostEstimate(
        flops=2 * n_pad * n_pad * H_PAD + 4 * n_pad * H_PAD * O_PAD,
        transcendentals=n_pad * O_PAD,
        bytes_accessed=n_pad * n_pad
        + (n_pad // tm) * n_pad * H_PAD * 2
        + n_pad * (H_PAD * 2 + O_PAD * 4 + 4),
    )
    out_pad = pl.pallas_call(
        sage2_kernel,
        out_shape=jax.ShapeDtypeStruct((n_pad, O_PAD), jnp.float32),
        grid_spec=pltpu.PrefetchScalarGridSpec(
            num_scalar_prefetch=0,
            grid=grid,
            in_specs=[
                a_spec,                                              # A tile (int8)
                pl.BlockSpec((tk, H_PAD), lambda i, k: (k, 0)),      # h1 (source rows)
                pl.BlockSpec((tm, H_PAD), lambda i, k: (i, 0)),      # h1 (root rows)
                pl.BlockSpec((tm, 1), lambda i, k: (i, 0)),          # 1/deg
                pl.BlockSpec((H_PAD, O_PAD), lambda i, k: (0, 0)),   # W2_l (resident)
                pl.BlockSpec((H_PAD, O_PAD), lambda i, k: (0, 0)),   # W2_r (resident)
                pl.BlockSpec((1, O_PAD), lambda i, k: (0, 0)),       # b2   (resident)
            ],
            out_specs=pl.BlockSpec((tm, O_PAD), lambda i, k: (i, 0)),
            scratch_shapes=[pltpu.VMEM((tm, H_PAD), jnp.float32)],
        ),
        compiler_params=cparams,
        cost_estimate=cost2,
    )(a_i8, h1, h1, inv_deg, w2l, w2r, b2)

    return out_pad[:n, :F_OUT]


# ---------------------------------------------------------------------------
# Params + pure-JAX reference (matches PyG SAGEConv mean-aggregation semantics)
# ---------------------------------------------------------------------------
def init_params(key):
    ks = jax.random.split(key, 6)
    scale1 = 1.0 / jnp.sqrt(F_IN)
    scale2 = 1.0 / jnp.sqrt(HIDDEN)
    return {
        # stored pre-transposed as [in, out] so the kernel does x @ W
        "w1l": jax.random.uniform(ks[0], (F_IN, HIDDEN), jnp.float32, -scale1, scale1),
        "w1r": jax.random.uniform(ks[1], (F_IN, HIDDEN), jnp.float32, -scale1, scale1),
        "b1":  jax.random.uniform(ks[2], (1, HIDDEN), jnp.float32, -scale1, scale1),
        "w2l": jax.random.uniform(ks[3], (HIDDEN, F_OUT), jnp.float32, -scale2, scale2),
        "w2r": jax.random.uniform(ks[4], (HIDDEN, F_OUT), jnp.float32, -scale2, scale2),
        "b2":  jax.random.uniform(ks[5], (1, F_OUT), jnp.float32, -scale2, scale2),
    }


def reference_forward(x, edge_index, params):
    n = x.shape[0]
    src, tgt = edge_index[0], edge_index[1]
    a = jnp.zeros((n, n), jnp.float32).at[tgt, src].add(1.0)
    a = a / jnp.maximum(jnp.sum(a, axis=1, keepdims=True), 1.0)
    h1 = (a @ x) @ params["w1l"] + x @ params["w1r"] + params["b1"]
    h1 = jnp.maximum(h1, 0.0)
    h2 = (a @ h1) @ params["w2l"] + h1 @ params["w2r"] + params["b2"]
    return jax.nn.log_softmax(h2, axis=1)


if __name__ == "__main__":
    key = jax.random.PRNGKey(0)
    keys = jax.random.split(key, 10)
    params = init_params(keys[0])

    # bf16 aggregation-path streaming (x, h1, A on the MXU) carries ~1e-3
    # relative logit error, so compare against the pure-f32 reference with a
    # bf16-appropriate tolerance.
    TOL = dict(atol=2e-2, rtol=2e-2)

    # 1) Tiny graph: fused single-call path (both SAGE layers in one kernel).
    N1, E1 = 8, 16
    x1 = jax.random.normal(keys[1], (N1, F_IN), jnp.float32)
    ei1 = jnp.stack([jax.random.randint(keys[2], (E1,), 0, N1),
                     jax.random.randint(keys[3], (E1,), 0, N1)], axis=0)
    out1 = gsgnet_forward(x1, ei1, params)
    jax.block_until_ready(out1)
    assert out1.shape == (N1, F_OUT)
    assert jnp.allclose(out1, reference_forward(x1, ei1, params), **TOL)

    # 2) Gridded path, grid=(2,2): k-axis accumulator, >=2 "parallel" row
    #    blocks, triple-buffered int8 adjacency, ragged-tail padding.
    N2, E2 = 200, 400
    x2 = jax.random.normal(keys[4], (N2, F_IN), jnp.float32)
    ei2 = jnp.stack([jax.random.randint(keys[5], (E2,), 0, N2),
                     jax.random.randint(keys[6], (E2,), 0, N2)], axis=0)
    out2 = gsgnet_forward(x2, ei2, params, tile=128)
    jax.block_until_ready(out2)
    assert out2.shape == (N2, F_OUT)
    assert jnp.allclose(out2, reference_forward(x2, ei2, params), **TOL)

    # 3) Gridded path with tm != tk (3 row blocks, single reduction block).
    N3, E3 = 300, 600
    x3 = jax.random.normal(keys[7], (N3, F_IN), jnp.float32)
    ei3 = jnp.stack([jax.random.randint(keys[8], (E3,), 0, N3),
                     jax.random.randint(keys[9], (E3,), 0, N3)], axis=0)
    out3 = gsgnet_forward(x3, ei3, params, tile=512)
    jax.block_until_ready(out3)
    assert out3.shape == (N3, F_OUT)
    assert jnp.allclose(out3, reference_forward(x3, ei3, params), **TOL)

    print("KERNEL_OK")
</pallas_src>

<mosaic_0001>
module attributes {stable_mosaic.version = 11 : i64} {
  func.func @fused_kernel(%arg0: i32, %arg1: memref<128x128xi8, #tpu.memory_space<vmem>>, %arg2: memref<128x16xf32, #tpu.memory_space<vmem>>, %arg3: memref<128x1xf32, #tpu.memory_space<vmem>>, %arg4: memref<16x128xf32, #tpu.memory_space<vmem>>, %arg5: memref<16x128xf32, #tpu.memory_space<vmem>>, %arg6: memref<1x128xf32, #tpu.memory_space<vmem>>, %arg7: memref<128x128xf32, #tpu.memory_space<vmem>>, %arg8: memref<128x128xf32, #tpu.memory_space<vmem>>, %arg9: memref<1x128xf32, #tpu.memory_space<vmem>>, %arg10: memref<128x128xf32, #tpu.memory_space<vmem>>) attributes {dimension_semantics = [#tpu.dimension_semantics<arbitrary>], iteration_bounds = array<i64: 1>, scalar_prefetch = 0 : i64, scratch_operands = 0 : i64, tpu.core_type = #tpu.core_type<tc>, window_params = [{pipeline_mode = #tpu.pipeline_mode<synchronous>, transform_indices = @transform_0, window_bounds = array<i64: 128, 128>}, {pipeline_mode = #tpu.pipeline_mode<synchronous>, transform_indices = @transform_1, window_bounds = array<i64: 128, 16>}, {pipeline_mode = #tpu.pipeline_mode<synchronous>, transform_indices = @transform_2, window_bounds = array<i64: 128, 1>}, {pipeline_mode = #tpu.pipeline_mode<synchronous>, transform_indices = @transform_3, window_bounds = array<i64: 16, 128>}, {pipeline_mode = #tpu.pipeline_mode<synchronous>, transform_indices = @transform_4, window_bounds = array<i64: 16, 128>}, {pipeline_mode = #tpu.pipeline_mode<synchronous>, transform_indices = @transform_5, window_bounds = array<i64: 1, 128>}, {pipeline_mode = #tpu.pipeline_mode<synchronous>, transform_indices = @transform_6, window_bounds = array<i64: 128, 128>}, {pipeline_mode = #tpu.pipeline_mode<synchronous>, transform_indices = @transform_7, window_bounds = array<i64: 128, 128>}, {pipeline_mode = #tpu.pipeline_mode<synchronous>, transform_indices = @transform_8, window_bounds = array<i64: 1, 128>}, {pipeline_mode = #tpu.pipeline_mode<synchronous>, transform_indices = @transform_9, window_bounds = array<i64: 128, 128>}]} {
    %c0 = arith.constant 0 : index
    %c0_0 = arith.constant 0 : index
    %0 = vector.load %arg1[%c0, %c0_0] : memref<128x128xi8, #tpu.memory_space<vmem>>, vector<128x128xi8>
    %1 = arith.sitofp %0 : vector<128x128xi8> to vector<128x128xbf16>
    %c0_1 = arith.constant 0 : index
    %c0_2 = arith.constant 0 : index
    %2 = vector.load %arg2[%c0_1, %c0_2] : memref<128x16xf32, #tpu.memory_space<vmem>>, vector<128x16xf32>
    %c0_3 = arith.constant 0 : index
    %c0_4 = arith.constant 0 : index
    %3 = vector.load %arg3[%c0_3, %c0_4] : memref<128x1xf32, #tpu.memory_space<vmem>>, vector<128x1xf32>
    %4 = arith.truncf %2 : vector<128x16xf32> to vector<128x16xbf16>
    %cst = arith.constant dense<0.000000e+00> : vector<128x16xf32>
    %5 = tpu.matmul %1, %4, %cst {dimension_numbers = #tpu.dot_dimension_numbers<[1], [0], [0], [1], [0, 0, 1, 1], [], []>} : vector<128x128xbf16>, vector<128x16xbf16>, vector<128x16xf32> -> vector<128x16xf32>
    %6 = vector.broadcast %3 : vector<128x1xf32> to vector<128x16xf32>
    %7 = arith.mulf %5, %6 : vector<128x16xf32>
    %c0_5 = arith.constant 0 : index
    %c0_6 = arith.constant 0 : index
    %8 = vector.load %arg4[%c0_5, %c0_6] : memref<16x128xf32, #tpu.memory_space<vmem>>, vector<16x128xf32>
    %cst_7 = arith.constant dense<0.000000e+00> : vector<128x128xf32>
    %9 = tpu.matmul %7, %8, %cst_7 {dimension_numbers = #tpu.dot_dimension_numbers<[1], [0], [0], [1], [0, 0, 1, 1], [], []>} : vector<128x16xf32>, vector<16x128xf32>, vector<128x128xf32> -> vector<128x128xf32>
    %c0_8 = arith.constant 0 : index
    %c0_9 = arith.constant 0 : index
    %10 = vector.load %arg5[%c0_8, %c0_9] : memref<16x128xf32, #tpu.memory_space<vmem>>, vector<16x128xf32>
    %cst_10 = arith.constant dense<0.000000e+00> : vector<128x128xf32>
    %11 = tpu.matmul %2, %10, %cst_10 {dimension_numbers = #tpu.dot_dimension_numbers<[1], [0], [0], [1], [0, 0, 1, 1], [], []>} : vector<128x16xf32>, vector<16x128xf32>, vector<128x128xf32> -> vector<128x128xf32>
    %12 = arith.addf %9, %11 : vector<128x128xf32>
    %c0_11 = arith.constant 0 : index
    %c0_12 = arith.constant 0 : index
    %13 = vector.load %arg6[%c0_11, %c0_12] : memref<1x128xf32, #tpu.memory_space<vmem>>, vector<1x128xf32>
    %14 = vector.broadcast %13 : vector<1x128xf32> to vector<128x128xf32>
    %15 = arith.addf %12, %14 : vector<128x128xf32>
    %cst_13 = arith.constant 0.000000e+00 : f32
    %16 = vector.broadcast %cst_13 : f32 to vector<128x128xf32>
    %17 = arith.maximumf %15, %16 : vector<128x128xf32>
    %18 = arith.truncf %17 : vector<128x128xf32> to vector<128x128xbf16>
    %cst_14 = arith.constant dense<0.000000e+00> : vector<128x128xf32>
    %19 = tpu.matmul %1, %18, %cst_14 {dimension_numbers = #tpu.dot_dimension_numbers<[1], [0], [0], [1], [0, 0, 1, 1], [], []>} : vector<128x128xbf16>, vector<128x128xbf16>, vector<128x128xf32> -> vector<128x128xf32>
    %20 = vector.broadcast %3 : vector<128x1xf32> to vector<128x128xf32>
    %21 = arith.mulf %19, %20 : vector<128x128xf32>
    %c0_15 = arith.constant 0 : index
    %c0_16 = arith.constant 0 : index
    %22 = vector.load %arg7[%c0_15, %c0_16] : memref<128x128xf32, #tpu.memory_space<vmem>>, vector<128x128xf32>
    %cst_17 = arith.constant dense<0.000000e+00> : vector<128x128xf32>
    %23 = tpu.matmul %21, %22, %cst_17 {dimension_numbers = #tpu.dot_dimension_numbers<[1], [0], [0], [1], [0, 0, 1, 1], [], []>} : vector<128x128xf32>, vector<128x128xf32>, vector<128x128xf32> -> vector<128x128xf32>
    %c0_18 = arith.constant 0 : index
    %c0_19 = arith.constant 0 : index
    %24 = vector.load %arg8[%c0_18, %c0_19] : memref<128x128xf32, #tpu.memory_space<vmem>>, vector<128x128xf32>
    %cst_20 = arith.constant dense<0.000000e+00> : vector<128x128xf32>
    %25 = tpu.matmul %17, %24, %cst_20 {dimension_numbers = #tpu.dot_dimension_numbers<[1], [0], [0], [1], [0, 0, 1, 1], [], []>} : vector<128x128xf32>, vector<128x128xf32>, vector<128x128xf32> -> vector<128x128xf32>
    %26 = arith.addf %23, %25 : vector<128x128xf32>
    %c0_21 = arith.constant 0 : index
    %c0_22 = arith.constant 0 : index
    %27 = vector.load %arg9[%c0_21, %c0_22] : memref<1x128xf32, #tpu.memory_space<vmem>>, vector<1x128xf32>
    %28 = vector.broadcast %27 : vector<1x128xf32> to vector<128x128xf32>
    %29 = arith.addf %26, %28 : vector<128x128xf32>
    %30 = tpu.iota {dimensions = array<i32: 1>} : vector<128x128xi32>
    %c24_i32 = arith.constant 24 : i32
    %31 = vector.broadcast %c24_i32 : i32 to vector<128x128xi32>
    %32 = arith.cmpi slt, %30, %31 : vector<128x128xi32>
    %cst_23 = arith.constant -1.000000e+30 : f32
    %33 = vector.broadcast %cst_23 : f32 to vector<128x128xf32>
    %34 = arith.select %32, %29, %33 : vector<128x128xi1>, vector<128x128xf32>
    %cst_24 = arith.constant dense<0xFF800000> : vector<128xf32>
    %35 = vector.multi_reduction <maximumf>, %34, %cst_24 [1] : vector<128x128xf32> to vector<128xf32>
    %36 = vector.shape_cast %35 : vector<128xf32> to vector<128x1xf32>
    %37 = vector.broadcast %36 : vector<128x1xf32> to vector<128x128xf32>
    %38 = arith.subf %34, %37 : vector<128x128xf32>
    %39 = math.exp %38 : vector<128x128xf32>
    %cst_25 = arith.constant dense<0.000000e+00> : vector<128xf32>
    %40 = vector.multi_reduction <add>, %39, %cst_25 [1] : vector<128x128xf32> to vector<128xf32>
    %41 = vector.shape_cast %40 : vector<128xf32> to vector<128x1xf32>
    %42 = math.log %41 : vector<128x1xf32>
    %43 = vector.broadcast %42 : vector<128x1xf32> to vector<128x128xf32>
    %44 = arith.subf %38, %43 : vector<128x128xf32>
    %c0_26 = arith.constant 0 : index
    %c0_27 = arith.constant 0 : index
    %45 = vector.load %arg10[%c0_26, %c0_27] : memref<128x128xf32, #tpu.memory_space<vmem>>, vector<128x128xf32>
    tpu.vector_store %arg10[%c0_26, %c0_27], %44 {strides = array<i32>} : memref<128x128xf32, #tpu.memory_space<vmem>>, vector<128x128xf32>,
    return
  }
  func.func @transform_0(%arg0: i32) -> (i32, i32) {
    %c0_i32 = arith.constant 0 : i32
    %c0_i32_0 = arith.constant 0 : i32
    %c0_i32_1 = arith.constant 0 : i32
    return %c0_i32, %c0_i32_0 : i32, i32
  }
  func.func @transform_1(%arg0: i32) -> (i32, i32) {
    %c0_i32 = arith.constant 0 : i32
    %c0_i32_0 = arith.constant 0 : i32
    %c0_i32_1 = arith.constant 0 : i32
    return %c0_i32, %c0_i32_0 : i32, i32
  }
  func.func @transform_2(%arg0: i32) -> (i32, i32) {
    %c0_i32 = arith.constant 0 : i32
    %c0_i32_0 = arith.constant 0 : i32
    %c0_i32_1 = arith.constant 0 : i32
    return %c0_i32, %c0_i32_0 : i32, i32
  }
  func.func @transform_3(%arg0: i32) -> (i32, i32) {
    %c0_i32 = arith.constant 0 : i32
    %c0_i32_0 = arith.constant 0 : i32
    %c0_i32_1 = arith.constant 0 : i32
    return %c0_i32, %c0_i32_0 : i32, i32
  }
  func.func @transform_4(%arg0: i32) -> (i32, i32) {
    %c0_i32 = arith.constant 0 : i32
    %c0_i32_0 = arith.constant 0 : i32
    %c0_i32_1 = arith.constant 0 : i32
    return %c0_i32, %c0_i32_0 : i32, i32
  }
  func.func @transform_5(%arg0: i32) -> (i32, i32) {
    %c0_i32 = arith.constant 0 : i32
    %c0_i32_0 = arith.constant 0 : i32
    %c0_i32_1 = arith.constant 0 : i32
    return %c0_i32, %c0_i32_0 : i32, i32
  }
  func.func @transform_6(%arg0: i32) -> (i32, i32) {
    %c0_i32 = arith.constant 0 : i32
    %c0_i32_0 = arith.constant 0 : i32
    %c0_i32_1 = arith.constant 0 : i32
    return %c0_i32, %c0_i32_0 : i32, i32
  }
  func.func @transform_7(%arg0: i32) -> (i32, i32) {
    %c0_i32 = arith.constant 0 : i32
    %c0_i32_0 = arith.constant 0 : i32
    %c0_i32_1 = arith.constant 0 : i32
    return %c0_i32, %c0_i32_0 : i32, i32
  }
  func.func @transform_8(%arg0: i32) -> (i32, i32) {
    %c0_i32 = arith.constant 0 : i32
    %c0_i32_0 = arith.constant 0 : i32
    %c0_i32_1 = arith.constant 0 : i32
    return %c0_i32, %c0_i32_0 : i32, i32
  }
  func.func @transform_9(%arg0: i32) -> (i32, i32) {
    %c0_i32 = arith.constant 0 : i32
    %c0_i32_0 = arith.constant 0 : i32
    %c0_i32_1 = arith.constant 0 : i32
    return %c0_i32, %c0_i32_0 : i32, i32
  }
}

</mosaic_0001>

<bundles_post_ra>
// kernel: tpu_custom_call.1
= control target key start
LH: loop header
LB: loop body
LE: loop exit
PB: predicated region body
PF: predicated region fallthrough
CT: control target
= control target key end

     0   :  { %14 = vsyncpa [#allocation3], 0  ;;  %s1900_s0 = inlined_call_operand.hbm [shape: s8[128,128], index: 0, kind: input, shape index: {}]   ;;  %s1901_s1 = inlined_call_operand.vmem [shape: f32[128,16], index: 1, kind: input, shape index: {}]   ;;  %s1902_s2 = inlined_call_operand.vmem [shape: f32[128,1], index: 2, kind: input, shape index: {}]   ;;  %s1903_s3 = inlined_call_operand.vmem [shape: f32[16,128], index: 3, kind: input, shape index: {}]   ;;  %s1904_s4 = inlined_call_operand.hbm [shape: f32[16,128], index: 4, kind: input, shape index: {}]   ;;  %s1905_s5 = inlined_call_operand.vmem [shape: f32[1,128], index: 5, kind: input, shape index: {}]   ;;  %s1906_s6 = inlined_call_operand.vmem [shape: f32[128,128], index: 6, kind: input, shape index: {}]   ;;  %s1907_s7 = inlined_call_operand.vmem [shape: f32[128,128], index: 7, kind: input, shape index: {}]   ;;  %s1908_s8 = inlined_call_operand.vmem [shape: f32[1,128], index: 8, kind: input, shape index: {}]   ;;  %s1909_s9 = inlined_call_operand.hbm [shape: f32[128,128], index: 9, kind: output, shape index: {}]  }
   0x1   :  { %15 = vsyncpa [#allocation6], 0 }
   0x2   :  { %16 = vsyncpa [#allocation4], 0  ;;  %s21_s11 = sshll.u32 %s1900_s0, 4  ;;  %s1222_s12 = smov [#allocation2]   ;;  %s22_s11 = int_to_ptr.hbm [resolvable:$true] %s21_s11 }
   0x3   :  { %s23_s13 = sshll.u32 %s1222_s12, 4  ;;  %s40_s16 = sshll.u32 %s1904_s4, 4  ;;  %s24_s13 = int_to_ptr.vmem [resolvable:$true] %s23_s13  ;;  %s41_s16 = int_to_ptr.hbm [resolvable:$true] %s40_s16 }
   0x4   :  { %s1223_s17 = smov 128   ;;  %s1224_s18 = smov 8  }
   0x5   :  { %29 = dma.hbm_to_vmem [thread:$0]  %s22_s11, 512, %s24_s13, [#allocation3], %s1223_s17, %s1223_s17, %s1224_s18  }
   0x6   :  { %s1225_s19 = smov [#allocation5]  }
   0x7   :  { %s42_s20 = sshll.u32 %s1225_s19, 4  ;;  %s43_s20 = int_to_ptr.vmem [resolvable:$true] %s42_s20 }
   0x8   :  { %48 = dma.hbm_to_vmem [thread:$0]  %s41_s16, 256, %s43_s20, [#allocation6], %s1223_s17, %s1223_s17, %s1224_s18  }
   0x9   :  { %1216 = dma.done.wait [#allocation3], 512  }
   0xa   :  { %1217 = vsyncadd [#allocation3], 4294966784 }
   0xb   :  { %1218 = dma.done.wait [#allocation6], 256  }
   0xc   :  { %1219 = vsyncadd [#allocation6], 4294967040  ;;  %v1293_v0 = vld [vmem:[%s1901_s1 + $0x70] sm:$0xff]  ;;  %v1298_v1 = vld [vmem:[%s1901_s1 + $0x78] sm:$0xff]  ;;  %v1226_v6 = vmov 0   ;;  %vm298_vm0 = vcmask 130048  }
   0xd   :  { %v1303_v2 = vld [vmem:[%s1901_s1 + $0x60] sm:$0xff]  ;;  %v148_v3 = vpack.c.bf16 %v1298_v1, %v1293_v0  ;;  %v1310_v4 = vld [vmem:[%s1901_s1 + $0x68] sm:$0xff]  ;;  %1075 = vset.pattern.permute.xlu0 %v1226_v6  ;;  %v1317_v7 = vld [vmem:[%s1901_s1 + $0x50] sm:$0xff]  ;;  %1076 = vset.pattern.permute.xlu1 %v1226_v6  ;;  %s1017_s19 = sshll.u32 %s1909_s9, 4  ;;  %s1018_s19 = int_to_ptr.hbm [resolvable:$true] %s1017_s19 }
   0xe   :  { %v147_v5 = vpack.c.bf16 %v1310_v4, %v1303_v2  ;;  %v1322_v8 = vld [vmem:[%s1901_s1 + $0x58] sm:$0xff]  ;;  %1077 = vset.pattern.permute.xlu2 %v1226_v6  ;;  %v125_v9 = vld [vmem:[%s1902_s2] sm:$0xff]  ;;  %v1337_v12 = vld [vmem:[%s1901_s1 + $0x48] sm:$0xff] }
   0xf   :  { %149 = vmatpush.bf16.msra.mxu0 %v148_v3  ;;  %200 = vperm.xlu0 %1075, %v125_v9   ;;  %v146_v10 = vpack.c.bf16 %v1322_v8, %v1317_v7  ;;  %v1332_v11 = vld [vmem:[%s1901_s1 + $0x40] sm:$0xff]  ;;  %v1344_v14 = vld [vmem:[%s1901_s1 + $0x30] sm:$0xff]  ;;  %v1349_v15 = vld [vmem:[%s1901_s1 + $0x38] sm:$0xff] }
  0x10   :  { %v145_v13 = vpack.c.bf16 %v1337_v12, %v1332_v11  ;;  %v144_v16 = vpack.c.bf16 %v1349_v15, %v1344_v14  ;;  %v1356_v17 = vld [vmem:[%s1901_s1 + $0x20] sm:$0xff]  ;;  %v1361_v18 = vld [vmem:[%s1901_s1 + $0x28] sm:$0xff]  ;;  %v1374_v23 = vld [vmem:[%s1901_s1 + $0x10] sm:$0xff] }
  0x11   :  { %v126_v19 = vld [vmem:[%s1902_s2 + $0x8] sm:$0xff]  ;;  %v143_v21 = vpack.c.bf16 %v1361_v18, %v1356_v17  ;;  %v65_v22 = vld [vmem:[#allocation2] sm:$0xff]  ;;  %v1379_v24 = vld [vmem:[%s1901_s1 + $0x18] sm:$0xff] }
  0x12   :  { %v134_v20 = vld [vmem:[%s1902_s2 + $0x48] sm:$0xff]  ;;  %205 = vperm.xlu1 %1076, %v126_v19   ;;  %v69_v25 = vunpack.c.0.s8 %v65_v22  ;;  %v70_v26 = vunpack.c.1.s8 %v65_v22  ;;  %v142_v27 = vpack.c.bf16 %v1379_v24, %v1374_v23  ;;  %v1386_v28 = vld [vmem:[%s1901_s1] sm:$0xff]  ;;  %v135_v34 = vld [vmem:[%s1902_s2 + $0x50] sm:$0xff]  ;;  %v71_v36 = vunpack.c.2.s8 %v65_v22 }
  0x13   :  { %150 = vmatpush.bf16.msra.mxu0 %v147_v5  ;;  %v1391_v29 = vld [vmem:[%s1901_s1 + $0x8] sm:$0xff]  ;;  %v128_v35 = vld [vmem:[%s1902_s2 + $0x18] sm:$0xff]  ;;  %v72_v37 = vunpack.c.3.s8 %v65_v22  ;;  %v137_v38 = vld [vmem:[%s1902_s2 + $0x60] sm:$0xff] }
  0x14   :  { %v85_v30 = vcvt.s32.f32 %v69_v25  ;;  %v86_v31 = vcvt.s32.f32 %v70_v26  ;;  %v141_v32 = vpack.c.bf16 %v1391_v29, %v1386_v28  ;;  %v87_v39 = vcvt.s32.f32 %v71_v36  ;;  %v127_v42 = vld [vmem:[%s1902_s2 + $0x10] sm:$0xff]  ;;  %v130_v43 = vld [vmem:[%s1902_s2 + $0x28] sm:$0xff]  ;;  %v136_v48 = vld [vmem:[%s1902_s2 + $0x58] sm:$0xff] }
  0x15   :  { %v88_v40 = vcvt.s32.f32 %v72_v37  ;;  %v138_v44 = vld [vmem:[%s1902_s2 + $0x68] sm:$0xff]  ;;  %210 = vperm.xlu2 %1077, %v127_v42   ;;  %v131_v49 = vld [vmem:[%s1902_s2 + $0x30] sm:$0xff]  ;;  %v129_v53 = vld [vmem:[%s1902_s2 + $0x20] sm:$0xff] }
  0x16   :  { %v1395_v33 = vpack.c.bf16 %v86_v31, %v85_v30  ;;  %v66_v45 = vld [vmem:[#allocation2 + $0x8] sm:$0xff]  ;;  %v133_v54 = vld [vmem:[%s1902_s2 + $0x40] sm:$0xff]  ;;  %v139_v60 = vld [vmem:[%s1902_s2 + $0x70] sm:$0xff] }
  0x17   :  { %151 = vmatpush.bf16.msra.mxu0 %v146_v10  ;;  %245 = vperm.xlu0 %1075, %v134_v20   ;;  %v1407_v41 = vpack.c.bf16 %v88_v40, %v87_v39  ;;  %v73_v46 = vunpack.c.0.s8 %v66_v45  ;;  %v74_v47 = vunpack.c.1.s8 %v66_v45  ;;  %v75_v55 = vunpack.c.2.s8 %v66_v45  ;;  %v140_v61 = vld [vmem:[%s1902_s2 + $0x78] sm:$0xff]  ;;  %v67_v62 = vld [vmem:[#allocation2 + $0x10] sm:$0xff]  ;;  %v295_v22 = vld [vmem:[%s1903_s3 + $0x8] sm:$0xff] }
  0x18   :  { %v76_v56 = vunpack.c.3.s8 %v66_v45  ;;  %v77_v63 = vunpack.c.0.s8 %v67_v62  ;;  %v78_v3 = vunpack.c.1.s8 %v67_v62  ;;  %v132_v5 = vld [vmem:[%s1902_s2 + $0x38] sm:$0xff]  ;;  %474 = vmatpush.msra.mxu2 %v295_v22 }
  0x19   :  { %v89_v50 = vcvt.s32.f32 %v73_v46  ;;  %v90_v51 = vcvt.s32.f32 %v74_v47  ;;  %v91_v57 = vcvt.s32.f32 %v75_v55  ;;  %v68_v25 = vld [vmem:[#allocation2 + $0x18] sm:$0xff] }
  0x1a   :  { %250 = vperm.xlu1 %1076, %v135_v34   ;;  %v92_v58 = vcvt.s32.f32 %v76_v56  ;;  %v93_v6 = vcvt.s32.f32 %v77_v63  ;;  %v94_v9 = vcvt.s32.f32 %v78_v3  ;;  %v81_v26 = vunpack.c.0.s8 %v68_v25  ;;  %v294_v34 = vld [vmem:[%s1903_s3] sm:$0xff]  ;;  %v665_v3 = vld [vmem:[%s1907_s7 + $0x78] sm:$0xff] }
  0x1b   :  { %152 = vmatpush.bf16.msra.mxu0 %v145_v13  ;;  %v1425_v52 = vpack.c.bf16 %v90_v51, %v89_v50  ;;  %v79_v13 = vunpack.c.2.s8 %v67_v62  ;;  %475 = vmatpush.msra.mxu2 %v294_v34  ;;  %v83_v36 = vunpack.c.2.s8 %v68_v25  ;;  %v84_v37 = vunpack.c.3.s8 %v68_v25 }
  0x1c   :  { %v1434_v59 = vpack.c.bf16 %v92_v58, %v91_v57  ;;  %v1446_v10 = vpack.c.bf16 %v94_v9, %v93_v6  ;;  %v97_v30 = vcvt.s32.f32 %v81_v26  ;;  %v659_v26 = vld [vmem:[%s1907_s7 + $0x48] sm:$0xff] }
  0x1d   :  { %255 = vperm.xlu2 %1077, %v136_v48   ;;  %v95_v19 = vcvt.s32.f32 %v79_v13  ;;  %v99_v39 = vcvt.s32.f32 %v83_v36  ;;  %v100_v40 = vcvt.s32.f32 %v84_v37  ;;  %v663_v13 = vld [vmem:[%s1907_s7 + $0x68] sm:$0xff]  ;;  %v654_v37 = vld [vmem:[%s1907_s7 + $0x20] sm:$0xff] }
  0x1f   :  { %153 = vmatpush.bf16.msra.mxu0 %v144_v16  ;;  %215 = vperm.xlu0 %1075, %v128_v35   ;;  %v80_v16 = vunpack.c.3.s8 %v67_v62  ;;  %v297_v35 = vld [vmem:[#allocation5 + $0x8] sm:$0xff]  ;;  %v1465_v42 = vpack.c.bf16 %v100_v40, %v99_v39  ;;  %v652_v39 = vld [vmem:[%s1907_s7 + $0x10] sm:$0xff] }
  0x20   :  { %1063 = vmatpush.msra.mxu1 %v297_v35  ;;  %1064 = vmatpush.msra.mxu3 %v297_v35 }
  0x21   :  { %v96_v20 = vcvt.s32.f32 %v80_v16  ;;  %v662_v16 = vld [vmem:[%s1907_s7 + $0x60] sm:$0xff] }
  0x22   :  { %260 = vperm.xlu1 %1076, %v137_v38   ;;  %v296_v38 = vld [vmem:[#allocation5] sm:$0xff] }
  0x23   :  { %154 = vmatpush.bf16.msra.mxu0 %v143_v21  ;;  %v1449_v21 = vpack.c.bf16 %v96_v20, %v95_v19  ;;  %1065 = vmatpush.msra.mxu1 %v296_v38  ;;  %v661_v19 = vld [vmem:[%s1907_s7 + $0x58] sm:$0xff]  ;;  %v660_v20 = vld [vmem:[%s1907_s7 + $0x50] sm:$0xff] }
  0x24   :  { %1037 = vmatmul.msk.f32.vlgmr.msra.gmra.mxu1 %vm298_vm0, %v1344_v14  ;;  %1066 = vmatpush.msra.mxu3 %v296_v38 }
  0x25   :  { %220 = vperm.xlu2 %1077, %v129_v53   ;;  %1046 = vmatmul.msk.f32.vlgmr.msra.gmra.mxu3 %vm298_vm0, %v1298_v1 }
  0x26   :  { %1067 = vmatpush.msrb.mxu3 %v295_v22  ;;  %666 = vmatpush.msrb.mxu1 %v665_v3 }
  0x27   :  { %155 = vmatpush.bf16.msra.mxu0 %v142_v27  ;;  %265 = vperm.xlu0 %1075, %v138_v44   ;;  %v82_v27 = vunpack.c.1.s8 %v68_v25 }
  0x28   :  { %1068 = vmatpush.msrb.mxu3 %v294_v34  ;;  %v655_v34 = vld [vmem:[%s1907_s7 + $0x28] sm:$0xff] }
  0x29   :  { %v98_v31 = vcvt.s32.f32 %v82_v27  ;;  %v658_v27 = vld [vmem:[%s1907_s7 + $0x40] sm:$0xff] }
  0x2a   :  { %225 = vperm.xlu1 %1076, %v130_v43  }
  0x2b   :  { %156 = vmatpush.bf16.msra.mxu0 %v141_v32  ;;  %v1455_v32 = vpack.c.bf16 %v98_v31, %v97_v30  ;;  %v657_v30 = vld [vmem:[%s1907_s7 + $0x38] sm:$0xff]  ;;  %v656_v31 = vld [vmem:[%s1907_s7 + $0x30] sm:$0xff] }
  0x2c   :  { %1038 = vmatmul.msk.f32.gmra.mxu1 %vm298_vm0, %v1349_v15 }
  0x2d   :  { %270 = vperm.xlu2 %1077, %v139_v60  }
  0x2e   :  { %157 = vmatmul.bf16.vlgmr.msra.gmra.mxu0 %v1395_v33 }
  0x2f   :  { %230 = vperm.xlu0 %1075, %v131_v49   ;;  %361 = vmatpush.msrb.mxu0 %v297_v35 }
  0x31   :  { %362 = vmatpush.msrb.mxu0 %v296_v38  ;;  %v653_v38 = vld [vmem:[%s1907_s7 + $0x18] sm:$0xff] }
  0x32   :  { %275 = vperm.xlu1 %1076, %v140_v61  }
  0x34   :  { %1039 = vmatmul.msk.f32.gmra.mxu1 %vm298_vm0, %v1332_v11 }
  0x35   :  { %235 = vperm.xlu2 %1077, %v132_v5   ;;  %v664_v5 = vld [vmem:[%s1907_s7 + $0x70] sm:$0xff] }
  0x36   :  { %667 = vmatpush.msrb.mxu1 %v664_v5 }
  0x37   :  { %240 = vperm.xlu0 %1075, %v133_v54  }
  0x38   :  { %668 = vmatpush.msrb.mxu1 %v663_v13 }
  0x3a   :  { %669 = vmatpush.msrb.mxu1 %v662_v16 }
  0x3c   :  { %1040 = vmatmul.msk.f32.gmra.mxu1 %vm298_vm0, %v1337_v12 }
  0x3d   :  { %670 = vmatpush.msrb.mxu1 %v661_v19 }
  0x3e   :  { %162 = vmatmul.bf16.gmra.mxu0 %v1407_v41 }
  0x3f   :  { %671 = vmatpush.msrb.mxu1 %v660_v20 }
  0x41   :  { %672 = vmatpush.msrb.mxu1 %v659_v26 }
  0x43   :  { %673 = vmatpush.msrb.mxu1 %v658_v27 }
  0x44   :  { %1041 = vmatmul.msk.f32.gmra.mxu1 %vm298_vm0, %v1317_v7 }
  0x45   :  { %674 = vmatpush.msrb.mxu1 %v657_v30 }
  0x47   :  { %675 = vmatpush.msrb.mxu1 %v656_v31 }
  0x49   :  { %676 = vmatpush.msrb.mxu1 %v655_v34 }
  0x4b   :  { %677 = vmatpush.msrb.mxu1 %v654_v37 }
  0x4c   :  { %1042 = vmatmul.msk.f32.gmra.mxu1 %vm298_vm0, %v1322_v8 }
  0x4d   :  { %678 = vmatpush.msrb.mxu1 %v653_v38 }
  0x4e   :  { %167 = vmatmul.bf16.gmra.mxu0 %v1425_v52 }
  0x4f   :  { %679 = vmatpush.msrb.mxu1 %v652_v39 }
  0x54   :  { %1043 = vmatmul.msk.f32.gmra.mxu1 %vm298_vm0, %v1303_v2 }
  0x5c   :  { %1044 = vmatmul.msk.f32.gmra.mxu1 %vm298_vm0, %v1310_v4 }
  0x5e   :  { %172 = vmatmul.bf16.gmra.mxu0 %v1434_v59 }
  0x64   :  { %1045 = vmatmul.msk.f32.gmra.mxu1 %vm298_vm0, %v1293_v0 }
  0x6e   :  { %177 = vmatmul.bf16.gmra.mxu0 %v1446_v10 }
  0x6f   :  { %v1485_v11 = vpop.permute.xlu2 %210 }
  0x77   :  { %v1500_v7 = vpop.permute.xlu2 %255 }
  0x7e   :  { %182 = vmatmul.bf16.gmra.mxu0 %v1449_v21 }
  0x7f   :  { %v1512_v50 = vpop.permute.xlu2 %220 }
  0x81   :  { %v1472_v43 = vpop.permute.xlu0 %200 }
  0x84   :  { %v1480_v1 = vpop.permute.xlu1 %205 }
  0x87   :  { %v1530_v4 = vpop.permute.xlu2 %270 }
  0x89   :  { %v1490_v12 = vpop.permute.xlu0 %245 }
  0x8c   :  { %v1495_v47 = vpop.permute.xlu1 %250 }
  0x8e   :  { %187 = vmatmul.bf16.gmra.mxu0 %v1455_v32 }
  0x8f   :  { %v1536_v57 = vpop.permute.xlu2 %235 }
  0x91   :  { %v1502_v48 = vpop.permute.xlu0 %215 }
  0x94   :  { %v1510_v8 = vpop.permute.xlu1 %260 }
  0x99   :  { %v1520_v2 = vpop.permute.xlu0 %265 }
  0x9c   :  { %v1522_v53 = vpop.permute.xlu1 %225 }
  0x9e   :  { %192 = vmatmul.bf16.gmra.mxu0 %v1465_v42 }
  0xa1   :  { %v1532_v55 = vpop.permute.xlu0 %230  ;;  %v382_v27 = vpop.f32.mrf.mxu1 }
  0xa9   :  { %v1540_v0 = vpop.permute.xlu0 %240  ;;  %v385_v39 = vpop.f32.mrf.mxu1 }
  0xab   :  { %v158_v14 = vpop.f32.mrf.mxu0 }
  0xac   :  { %v278_v44 = vmul.f32 %v1472_v43, %v158_v14 }
  0xae   :  { %1047 = vmatmul.msk.f32.vlgmr.msra.gmra.mxu2 %vm298_vm0, %v278_v44  ;;  %1031 = vmatmul.msk.f32.vlgmr.msrb.gmra.mxu0 %vm298_vm0, %v1386_v28  ;;  %v651_v44 = vld [vmem:[%s1907_s7 + $0x8] sm:$0xff] }
  0xaf   :  { %680 = vmatpush.msrb.mxu1 %v651_v44 }
  0xb3   :  { %v160_v15 = vpop.f32.mrf.mxu0 }
  0xb4   :  { %v279_v45 = vmul.f32 %v1480_v1, %v160_v15  ;;  %v650_v15 = vld [vmem:[%s1907_s7] sm:$0xff] }
  0xb5   :  { %681 = vmatpush.msrb.mxu1 %v650_v15 }
  0xb6   :  { %1048 = vmatmul.msk.f32.gmra.mxu2 %vm298_vm0, %v279_v45  ;;  %1032 = vmatmul.msk.f32.gmra.mxu0 %vm298_vm0, %v1391_v29 }
  0xbb   :  { %v163_v46 = vpop.f32.mrf.mxu0 }
  0xbc   :  { %v280_v28 = vmul.f32 %v1485_v11, %v163_v46 }
  0xbe   :  { %1049 = vmatmul.msk.f32.gmra.mxu2 %vm298_vm0, %v280_v28  ;;  %1033 = vmatmul.msk.f32.gmra.mxu0 %vm298_vm0, %v1374_v23  ;;  %v1604_v28 = vpop.permute.xlu1 %275 }
  0xc3   :  { %v165_v29 = vpop.f32.mrf.mxu0 }
  0xc4   :  { %v281_v49 = vmul.f32 %v1502_v48, %v165_v29 }
  0xc6   :  { %1050 = vmatmul.msk.f32.gmra.mxu2 %vm298_vm0, %v281_v49  ;;  %1034 = vmatmul.msk.f32.gmra.mxu0 %vm298_vm0, %v1379_v24 }
  0xcb   :  { %v168_v23 = vpop.f32.mrf.mxu0 }
  0xcc   :  { %v282_v51 = vmul.f32 %v1512_v50, %v168_v23 }
  0xce   :  { %1051 = vmatmul.msk.f32.gmra.mxu2 %vm298_vm0, %v282_v51  ;;  %1035 = vmatmul.msk.f32.gmra.mxu0 %vm298_vm0, %v1356_v17  ;;  %v1611_v51 = vld [vmem:[%s1905_s5] ss:$0 sm:$0xff] }
  0xd3   :  { %v170_v24 = vpop.f32.mrf.mxu0 }
  0xd4   :  { %v283_v54 = vmul.f32 %v1522_v53, %v170_v24 }
  0xd6   :  { %1052 = vmatmul.msk.f32.gmra.mxu2 %vm298_vm0, %v283_v54  ;;  %1036 = vmatmul.msk.f32.gmra.mxu0 %vm298_vm0, %v1361_v18 }
  0xdb   :  { %v173_v17 = vpop.f32.mrf.mxu0 }
  0xdc   :  { %v284_v56 = vmul.f32 %v1532_v55, %v173_v17 }
  0xde   :  { %1053 = vmatmul.msk.f32.gmra.mxu2 %vm298_vm0, %v284_v56 }
  0xe3   :  { %v175_v58 = vpop.f32.mrf.mxu0 }
  0xe4   :  { %v285_v60 = vmul.f32 %v1536_v57, %v175_v58 }
  0xe6   :  { %1054 = vmatmul.msk.f32.gmra.mxu2 %vm298_vm0, %v285_v60 }
  0xeb   :  { %v178_v61 = vpop.f32.mrf.mxu0 }
  0xec   :  { %v286_v18 = vmul.f32 %v1540_v0, %v178_v61 }
  0xee   :  { %1055 = vmatmul.msk.f32.gmra.mxu2 %vm298_vm0, %v286_v18 }
  0xf3   :  { %v180_v62 = vpop.f32.mrf.mxu0 }
  0xf4   :  { %v287_v63 = vmul.f32 %v1490_v12, %v180_v62 }
  0xf6   :  { %1056 = vmatmul.msk.f32.vlgmr.msrb.gmra.mxu3 %vm298_vm0, %v287_v63 }
  0xfb   :  { %v183_v6 = vpop.f32.mrf.mxu0 }
  0xfc   :  { %v288_v9 = vmul.f32 %v1495_v47, %v183_v6 }
  0xfe   :  { %1057 = vmatmul.msk.f32.gmra.mxu3 %vm298_vm0, %v288_v9 }
 0x103   :  { %v185_v22 = vpop.f32.mrf.mxu0 }
 0x104   :  { %v289_v25 = vmul.f32 %v1500_v7, %v185_v22 }
 0x106   :  { %1058 = vmatmul.msk.f32.gmra.mxu3 %vm298_vm0, %v289_v25 }
 0x10b   :  { %v188_v35 = vpop.f32.mrf.mxu0 }
 0x10c   :  { %v290_v36 = vmul.f32 %v1510_v8, %v188_v35 }
 0x10e   :  { %1059 = vmatmul.msk.f32.gmra.mxu3 %vm298_vm0, %v290_v36 }
 0x113   :  { %v190_v40 = vpop.f32.mrf.mxu0 }
 0x114   :  { %v291_v14 = vmul.f32 %v1520_v2, %v190_v40 }
 0x116   :  { %1060 = vmatmul.msk.f32.gmra.mxu3 %vm298_vm0, %v291_v14 }
 0x11b   :  { %v193_v45 = vpop.f32.mrf.mxu0 }
 0x11c   :  { %v292_v46 = vmul.f32 %v1530_v4, %v193_v45 }
 0x11e   :  { %1061 = vmatmul.msk.f32.gmra.mxu3 %vm298_vm0, %v292_v46 }
 0x123   :  { %v195_v29 = vpop.f32.mrf.mxu0 }
 0x124   :  { %v293_v49 = vmul.f32 %v1604_v28, %v195_v29  ;;  %v388_v29 = vpop.f32.mrf.mxu1 }
 0x126   :  { %1062 = vmatmul.msk.f32.gmra.mxu3 %vm298_vm0, %v293_v49 }
 0x12b   :  { %v364_v23 = vpop.f32.mrf.mxu0 }
 0x131   :  { %v477_v24 = vpop.f32.mrf.mxu2 }
 0x132   :  { %v478_v54 = vadd.f32 %v477_v24, %v364_v23 }
 0x133   :  { %v367_v17 = vpop.f32.mrf.mxu0 }
 0x134   :  { %v529_v56 = vadd.f32 %v1611_v51, %v478_v54 }
 0x136   :  { %v545_v58 = vmax.f32 %v529_v56, 0.0  ;;  %v391_v56 = vpop.f32.mrf.mxu1 }
 0x138   :  { %682 = vmatmul.f32.vlgmr.msrb.gmra.mxu1 %v545_v58 }
 0x139   :  { %v480_v60 = vpop.f32.mrf.mxu2 }
 0x13a   :  { %v481_v61 = vadd.f32 %v480_v60, %v367_v17  ;;  %v409_v60 = vpop.f32.mrf.mxu3 }
 0x13b   :  { %v370_v18 = vpop.f32.mrf.mxu0 }
 0x13c   :  { %v530_v62 = vadd.f32 %v1611_v51, %v481_v61 }
 0x13e   :  { %v546_v63 = vmax.f32 %v530_v62, 0.0 }
 0x140   :  { %v1615_v3 = vpack.c.bf16 %v546_v63, %v545_v58  ;;  %685 = vmatmul.f32.gmra.mxu1 %v546_v63 }
 0x141   :  { %v483_v5 = vpop.f32.mrf.mxu2 }
 0x142   :  { %v484_v6 = vadd.f32 %v483_v5, %v370_v18 }
 0x143   :  { %v373_v9 = vpop.f32.mrf.mxu0 }
 0x144   :  { %v531_v13 = vadd.f32 %v1611_v51, %v484_v6  ;;  %v394_v6 = vpop.f32.mrf.mxu1 }
 0x146   :  { %v547_v16 = vmax.f32 %v531_v13, 0.0 }
 0x148   :  { %688 = vmatmul.f32.gmra.mxu1 %v547_v16 }
 0x149   :  { %v486_v19 = vpop.f32.mrf.mxu2 }
 0x14a   :  { %v487_v20 = vadd.f32 %v486_v19, %v373_v9 }
 0x14b   :  { %v376_v25 = vpop.f32.mrf.mxu0 }
 0x14c   :  { %v532_v22 = vadd.f32 %v1611_v51, %v487_v20 }
 0x14e   :  { %v548_v26 = vmax.f32 %v532_v22, 0.0  ;;  %v397_v22 = vpop.f32.mrf.mxu1 }
 0x150   :  { %v1619_v30 = vpack.c.bf16 %v548_v26, %v547_v16  ;;  %691 = vmatmul.f32.gmra.mxu1 %v548_v26 }
 0x151   :  { %v489_v31 = vpop.f32.mrf.mxu2 }
 0x152   :  { %v490_v34 = vadd.f32 %v489_v31, %v376_v25 }
 0x153   :  { %v379_v37 = vpop.f32.mrf.mxu0 }
 0x154   :  { %v533_v35 = vadd.f32 %v1611_v51, %v490_v34 }
 0x156   :  { %v549_v36 = vmax.f32 %v533_v35, 0.0  ;;  %v400_v35 = vpop.f32.mrf.mxu1 }
 0x158   :  { %694 = vmatmul.f32.gmra.mxu1 %v549_v36 }
 0x159   :  { %v492_v38 = vpop.f32.mrf.mxu2 }
 0x15a   :  { %v493_v40 = vadd.f32 %v492_v38, %v379_v37 }
 0x15c   :  { %v534_v14 = vadd.f32 %v1611_v51, %v493_v40 }
 0x15e   :  { %v550_v44 = vmax.f32 %v534_v14, 0.0  ;;  %v403_v14 = vpop.f32.mrf.mxu1 }
 0x160   :  { %v1623_v15 = vpack.c.bf16 %v550_v44, %v549_v36  ;;  %697 = vmatmul.f32.gmra.mxu1 %v550_v44 }
 0x161   :  { %v495_v45 = vpop.f32.mrf.mxu2 }
 0x162   :  { %v496_v46 = vadd.f32 %v495_v45, %v382_v27 }
 0x164   :  { %v535_v49 = vadd.f32 %v1611_v51, %v496_v46 }
 0x166   :  { %v551_v23 = vmax.f32 %v535_v49, 0.0 }
 0x168   :  { %700 = vmatmul.f32.gmra.mxu1 %v551_v23 }
 0x169   :  { %v498_v24 = vpop.f32.mrf.mxu2 }
 0x16a   :  { %v499_v54 = vadd.f32 %v498_v24, %v385_v39 }
 0x16c   :  { %v536_v17 = vadd.f32 %v1611_v51, %v499_v54 }
 0x16e   :  { %v552_v58 = vmax.f32 %v536_v17, 0.0 }
 0x170   :  { %v564_v61 = vpack.c.bf16 %v552_v58, %v551_v23  ;;  %703 = vmatmul.f32.gmra.mxu1 %v552_v58  ;;  %v406_v23 = vpop.f32.mrf.mxu1 }
 0x171   :  { %v501_v18 = vpop.f32.mrf.mxu2 }
 0x172   :  { %v502_v62 = vadd.f32 %v501_v18, %v388_v29 }
 0x174   :  { %v537_v63 = vadd.f32 %v1611_v51, %v502_v62 }
 0x176   :  { %v553_v5 = vmax.f32 %v537_v63, 0.0 }
 0x178   :  { %706 = vmatmul.f32.gmra.mxu1 %v553_v5 }
 0x179   :  { %v504_v9 = vpop.f32.mrf.mxu3 }
 0x17a   :  { %v505_v13 = vadd.f32 %v504_v9, %v391_v56 }
 0x17c   :  { %v538_v16 = vadd.f32 %v1611_v51, %v505_v13 }
 0x17e   :  { %v554_v19 = vmax.f32 %v538_v16, 0.0 }
 0x180   :  { %709 = vmatmul.f32.gmra.mxu1 %v554_v19  ;;  %v565_v16 = vpack.c.bf16 %v554_v19, %v553_v5  ;;  %v637_v5 = vld [vmem:[%s1906_s6 + $0x18] sm:$0xff]  ;;  %v636_v19 = vld [vmem:[%s1906_s6 + $0x10] sm:$0xff] }
 0x181   :  { %v507_v20 = vpop.f32.mrf.mxu3 }
 0x182   :  { %v508_v25 = vadd.f32 %v507_v20, %v394_v6  ;;  %v635_v20 = vld [vmem:[%s1906_s6 + $0x8] sm:$0xff] }
 0x184   :  { %v539_v26 = vadd.f32 %v1611_v51, %v508_v25 }
 0x186   :  { %v555_v27 = vmax.f32 %v539_v26, 0.0 }
 0x188   :  { %712 = vmatmul.f32.gmra.mxu1 %v555_v27 }
 0x189   :  { %v510_v31 = vpop.f32.mrf.mxu3 }
 0x18a   :  { %v511_v34 = vadd.f32 %v510_v31, %v397_v22  ;;  %v634_v22 = vld [vmem:[%s1906_s6] sm:$0xff] }
 0x18c   :  { %v540_v36 = vadd.f32 %v1611_v51, %v511_v34 }
 0x18e   :  { %v556_v37 = vmax.f32 %v540_v36, 0.0 }
 0x190   :  { %715 = vmatmul.f32.gmra.mxu1 %v556_v37  ;;  %v566_v13 = vpack.c.bf16 %v556_v37, %v555_v27 }
 0x191   :  { %v513_v38 = vpop.f32.mrf.mxu3 }
 0x192   :  { %v514_v39 = vadd.f32 %v513_v38, %v400_v35 }
 0x194   :  { %v541_v40 = vadd.f32 %v1611_v51, %v514_v39 }
 0x196   :  { %v557_v44 = vmax.f32 %v541_v40, 0.0 }
 0x198   :  { %718 = vmatmul.f32.gmra.mxu1 %v557_v44 }
 0x199   :  { %v516_v45 = vpop.f32.mrf.mxu3 }
 0x19a   :  { %v517_v46 = vadd.f32 %v516_v45, %v403_v14 }
 0x19c   :  { %v542_v29 = vadd.f32 %v1611_v51, %v517_v46 }
 0x19e   :  { %v558_v49 = vmax.f32 %v542_v29, 0.0 }
 0x1a0   :  { %721 = vmatmul.f32.gmra.mxu1 %v558_v49  ;;  %v567_v9 = vpack.c.bf16 %v558_v49, %v557_v44 }
 0x1a1   :  { %v519_v24 = vpop.f32.mrf.mxu3 }
 0x1a2   :  { %v520_v54 = vadd.f32 %v519_v24, %v406_v23 }
 0x1a4   :  { %v543_v17 = vadd.f32 %v1611_v51, %v520_v54 }
 0x1a6   :  { %v559_v56 = vmax.f32 %v543_v17, 0.0 }
 0x1a8   :  { %724 = vmatmul.f32.gmra.mxu1 %v559_v56 }
 0x1a9   :  { %v522_v58 = vpop.f32.mrf.mxu3 }
 0x1aa   :  { %v523_v18 = vadd.f32 %v522_v58, %v409_v60  ;;  %v640_v60 = vld [vmem:[%s1906_s6 + $0x30] sm:$0xff] }
 0x1ac   :  { %v544_v62 = vadd.f32 %v1611_v51, %v523_v18  ;;  %v649_v51 = vld [vmem:[%s1906_s6 + $0x78] sm:$0xff] }
 0x1ad   :  { %731 = vmatpush.msrb.mxu2 %v649_v51 }
 0x1ae   :  { %v560_v63 = vmax.f32 %v544_v62, 0.0 }
 0x1b0   :  { %v568_v6 = vpack.c.bf16 %v560_v63, %v559_v56  ;;  %727 = vmatmul.f32.gmra.mxu1 %v560_v63  ;;  %v816_v56 = vlaneseq }
 0x1b2   :  { %569 = vmatpush.bf16.msra.mxu3 %v568_v6  ;;  %v1710_v58 = vand.u32 127, %v816_v56 }
 0x1b4   :  { %vm818_vm1 = vcmp.lt.s32.totalorder %v1710_v58, 24 }
 0x1b5   :  { %v683_v49 = vpop.f32.mrf.mxu1 }
 0x1b6   :  { %570 = vmatpush.bf16.msra.mxu3 %v567_v9 }
 0x1ba   :  { %571 = vmatpush.bf16.msra.mxu3 %v566_v13 }
 0x1bd   :  { %v686_v54 = vpop.f32.mrf.mxu1 }
 0x1be   :  { %572 = vmatpush.bf16.msra.mxu3 %v565_v16 }
 0x1c2   :  { %573 = vmatpush.bf16.msra.mxu3 %v564_v61  ;;  %v638_v61 = vld [vmem:[%s1906_s6 + $0x20] sm:$0xff] }
 0x1c6   :  { %574 = vmatpush.bf16.msra.mxu3 %v1623_v15  ;;  %v648_v15 = vld [vmem:[%s1906_s6 + $0x70] sm:$0xff] }
 0x1c7   :  { %732 = vmatpush.msrb.mxu2 %v648_v15 }
 0x1ca   :  { %575 = vmatpush.bf16.msra.mxu3 %v1619_v30  ;;  %v641_v30 = vld [vmem:[%s1906_s6 + $0x38] sm:$0xff] }
 0x1ce   :  { %576 = vmatpush.bf16.msra.mxu3 %v1615_v3  ;;  %v642_v3 = vld [vmem:[%s1906_s6 + $0x40] sm:$0xff] }
 0x1d1   :  { %577 = vmatmul.bf16.vlgmr.msra.gmra.mxu3 %v1395_v33  ;;  %v647_v33 = vld [vmem:[%s1906_s6 + $0x68] sm:$0xff] }
 0x1d2   :  { %733 = vmatpush.msrb.mxu2 %v647_v33 }
 0x1e1   :  { %582 = vmatmul.bf16.gmra.mxu3 %v1407_v41  ;;  %v646_v41 = vld [vmem:[%s1906_s6 + $0x60] sm:$0xff] }
 0x1e2   :  { %734 = vmatpush.msrb.mxu2 %v646_v41 }
 0x1f1   :  { %587 = vmatmul.bf16.gmra.mxu3 %v1425_v52  ;;  %v645_v52 = vld [vmem:[%s1906_s6 + $0x58] sm:$0xff] }
 0x1f2   :  { %735 = vmatpush.msrb.mxu2 %v645_v52 }
 0x201   :  { %592 = vmatmul.bf16.gmra.mxu3 %v1434_v59  ;;  %v644_v59 = vld [vmem:[%s1906_s6 + $0x50] sm:$0xff] }
 0x202   :  { %736 = vmatpush.msrb.mxu2 %v644_v59 }
 0x211   :  { %597 = vmatmul.bf16.gmra.mxu3 %v1446_v10  ;;  %v643_v10 = vld [vmem:[%s1906_s6 + $0x48] sm:$0xff] }
 0x212   :  { %737 = vmatpush.msrb.mxu2 %v643_v10 }
 0x214   :  { %738 = vmatpush.msrb.mxu2 %v642_v3 }
 0x216   :  { %739 = vmatpush.msrb.mxu2 %v641_v30 }
 0x218   :  { %740 = vmatpush.msrb.mxu2 %v640_v60 }
 0x221   :  { %602 = vmatmul.bf16.gmra.mxu3 %v1449_v21  ;;  %v639_v21 = vld [vmem:[%s1906_s6 + $0x28] sm:$0xff] }
 0x222   :  { %741 = vmatpush.msrb.mxu2 %v639_v21 }
 0x224   :  { %742 = vmatpush.msrb.mxu2 %v638_v61 }
 0x226   :  { %743 = vmatpush.msrb.mxu2 %v637_v5 }
 0x228   :  { %744 = vmatpush.msrb.mxu2 %v636_v19 }
 0x22a   :  { %745 = vmatpush.msrb.mxu2 %v635_v20 }
 0x22c   :  { %746 = vmatpush.msrb.mxu2 %v634_v22 }
 0x231   :  { %607 = vmatmul.bf16.gmra.mxu3 %v1455_v32 }
 0x241   :  { %612 = vmatmul.bf16.gmra.mxu3 %v1465_v42 }
 0x254   :  { %v578_v25 = vpop.f32.mrf.mxu3 }
 0x255   :  { %v618_v26 = vmul.f32 %v578_v25, %v1472_v43 }
 0x257   :  { %747 = vmatmul.f32.vlgmr.msrb.gmra.mxu2 %v618_v26 }
 0x25c   :  { %v580_v27 = vpop.f32.mrf.mxu3 }
 0x25d   :  { %v619_v31 = vmul.f32 %v580_v27, %v1480_v1 }
 0x25f   :  { %750 = vmatmul.f32.gmra.mxu2 %v619_v31 }
 0x264   :  { %v583_v32 = vpop.f32.mrf.mxu3 }
 0x265   :  { %v620_v34 = vmul.f32 %v583_v32, %v1485_v11 }
 0x267   :  { %753 = vmatmul.f32.gmra.mxu2 %v620_v34 }
 0x26c   :  { %v585_v35 = vpop.f32.mrf.mxu3 }
 0x26d   :  { %v621_v36 = vmul.f32 %v585_v35, %v1502_v48 }
 0x26f   :  { %756 = vmatmul.f32.gmra.mxu2 %v621_v36 }
 0x274   :  { %v588_v37 = vpop.f32.mrf.mxu3 }
 0x275   :  { %v622_v38 = vmul.f32 %v588_v37, %v1512_v50 }
 0x277   :  { %759 = vmatmul.f32.gmra.mxu2 %v622_v38 }
 0x27c   :  { %v590_v42 = vpop.f32.mrf.mxu3 }
 0x27d   :  { %v623_v43 = vmul.f32 %v590_v42, %v1522_v53 }
 0x27f   :  { %762 = vmatmul.f32.gmra.mxu2 %v623_v43 }
 0x284   :  { %v593_v39 = vpop.f32.mrf.mxu3 }
 0x285   :  { %v624_v1 = vmul.f32 %v593_v39, %v1532_v55 }
 0x287   :  { %765 = vmatmul.f32.gmra.mxu2 %v624_v1 }
 0x28c   :  { %v595_v40 = vpop.f32.mrf.mxu3 }
 0x28d   :  { %v625_v11 = vmul.f32 %v595_v40, %v1536_v57 }
 0x28f   :  { %768 = vmatmul.f32.gmra.mxu2 %v625_v11 }
 0x294   :  { %v598_v14 = vpop.f32.mrf.mxu3 }
 0x295   :  { %v626_v48 = vmul.f32 %v598_v14, %v1540_v0 }
 0x297   :  { %771 = vmatmul.f32.gmra.mxu2 %v626_v48 }
 0x29c   :  { %v600_v44 = vpop.f32.mrf.mxu3 }
 0x29d   :  { %v627_v50 = vmul.f32 %v600_v44, %v1490_v12 }
 0x29f   :  { %774 = vmatmul.f32.gmra.mxu2 %v627_v50 }
 0x2a4   :  { %v603_v45 = vpop.f32.mrf.mxu3 }
 0x2a5   :  { %v628_v53 = vmul.f32 %v603_v45, %v1495_v47 }
 0x2a7   :  { %777 = vmatmul.f32.gmra.mxu2 %v628_v53 }
 0x2ac   :  { %v605_v46 = vpop.f32.mrf.mxu3 }
 0x2ad   :  { %v629_v55 = vmul.f32 %v605_v46, %v1500_v7  ;;  %v689_v7 = vpop.f32.mrf.mxu1 }
 0x2af   :  { %780 = vmatmul.f32.gmra.mxu2 %v629_v55 }
 0x2b4   :  { %v608_v29 = vpop.f32.mrf.mxu3 }
 0x2b5   :  { %v630_v57 = vmul.f32 %v608_v29, %v1510_v8  ;;  %v1715_v8 = vld [vmem:[%s1908_s8] ss:$0 sm:$0xff]  ;;  %s1227_s8 = smov [#allocation7]  }
 0x2b6   :  { %s1015_s14 = sshll.u32 %s1227_s8, 4  ;;  %s1016_s14 = int_to_ptr.vmem [resolvable:$true] %s1015_s14 }
 0x2b7   :  { %783 = vmatmul.f32.gmra.mxu2 %v630_v57 }
 0x2bc   :  { %v610_v23 = vpop.f32.mrf.mxu3 }
 0x2bd   :  { %v631_v0 = vmul.f32 %v610_v23, %v1520_v2  ;;  %v692_v2 = vpop.f32.mrf.mxu1 }
 0x2bf   :  { %786 = vmatmul.f32.gmra.mxu2 %v631_v0 }
 0x2c4   :  { %v613_v24 = vpop.f32.mrf.mxu3 }
 0x2c5   :  { %v632_v12 = vmul.f32 %v613_v24, %v1530_v4  ;;  %v695_v9 = vpop.f32.mrf.mxu1 }
 0x2c7   :  { %789 = vmatmul.f32.gmra.mxu2 %v632_v12 }
 0x2cc   :  { %v615_v47 = vpop.f32.mrf.mxu3 }
 0x2cd   :  { %v633_v17 = vmul.f32 %v615_v47, %v1604_v28  ;;  %v698_v41 = vpop.f32.mrf.mxu1 }
 0x2cf   :  { %792 = vmatmul.f32.gmra.mxu2 %v633_v17 }
 0x2d5   :  { %v701_v60 = vpop.f32.mrf.mxu1 }
 0x2da   :  { %v748_v18 = vpop.f32.mrf.mxu2 }
 0x2db   :  { %v749_v62 = vadd.f32 %v748_v18, %v683_v49 }
 0x2dd   :  { %v800_v4 = vadd.f32 %v1715_v8, %v749_v62  ;;  %v704_v20 = vpop.f32.mrf.mxu1 }
 0x2df   :  { %v1721_v28 = vsel %vm818_vm1, %v800_v4, -1e+30 }
 0x2e0   :  { %835 = vmax.xlane.f32.xlu1 %v1721_v28 }
 0x2e2   :  { %v751_v63 = vpop.f32.mrf.mxu2 }
 0x2e3   :  { %v752_v6 = vadd.f32 %v751_v63, %v686_v54 }
 0x2e5   :  { %v801_v13 = vadd.f32 %v1715_v8, %v752_v6  ;;  %v707_v34 = vpop.f32.mrf.mxu1 }
 0x2e7   :  { %v1727_v16 = vsel %vm818_vm1, %v801_v13, -1e+30 }
 0x2e8   :  { %837 = vmax.xlane.f32.xlu2 %v1727_v16 }
 0x2ea   :  { %v754_v51 = vpop.f32.mrf.mxu2 }
 0x2eb   :  { %v755_v15 = vadd.f32 %v754_v51, %v689_v7 }
 0x2ed   :  { %v802_v33 = vadd.f32 %v1715_v8, %v755_v15  ;;  %v710_v43 = vpop.f32.mrf.mxu1 }
 0x2ef   :  { %v1733_v52 = vsel %vm818_vm1, %v802_v33, -1e+30 }
 0x2f0   :  { %839 = vmax.xlane.f32.xlu0 %v1733_v52 }
 0x2f2   :  { %v757_v59 = vpop.f32.mrf.mxu2 }
 0x2f3   :  { %v758_v10 = vadd.f32 %v757_v59, %v692_v2 }
 0x2f5   :  { %v803_v3 = vadd.f32 %v1715_v8, %v758_v10  ;;  %v713_v48 = vpop.f32.mrf.mxu1 }
 0x2f7   :  { %v1739_v30 = vsel %vm818_vm1, %v803_v3, -1e+30 }
 0x2f8   :  { %841 = vmax.xlane.f32.xlu2 %v1739_v30 }
 0x2fa   :  { %v760_v21 = vpop.f32.mrf.mxu2 }
 0x2fb   :  { %v761_v61 = vadd.f32 %v760_v21, %v695_v9 }
 0x2fd   :  { %v804_v5 = vadd.f32 %v1715_v8, %v761_v61  ;;  %v716_v46 = vpop.f32.mrf.mxu1 }
 0x2ff   :  { %v1745_v19 = vsel %vm818_vm1, %v804_v5, -1e+30 }
 0x300   :  { %843 = vmax.xlane.f32.xlu1 %v1745_v19 }
 0x302   :  { %v763_v22 = vpop.f32.mrf.mxu2 }
 0x303   :  { %v764_v25 = vadd.f32 %v763_v22, %v698_v41 }
 0x305   :  { %v805_v26 = vadd.f32 %v1715_v8, %v764_v25  ;;  %v719_v24 = vpop.f32.mrf.mxu1 }
 0x307   :  { %v1751_v27 = vsel %vm818_vm1, %v805_v26, -1e+30 }
 0x308   :  { %845 = vmax.xlane.f32.xlu2 %v1751_v27 }
 0x30a   :  { %v766_v31 = vpop.f32.mrf.mxu2 }
 0x30b   :  { %v767_v32 = vadd.f32 %v766_v31, %v701_v60 }
 0x30d   :  { %v806_v35 = vadd.f32 %v1715_v8, %v767_v32  ;;  %v722_v56 = vpop.f32.mrf.mxu1 }
 0x30f   :  { %v1757_v36 = vsel %vm818_vm1, %v806_v35, -1e+30 }
 0x310   :  { %847 = vmax.xlane.f32.xlu0 %v1757_v36 }
 0x312   :  { %v769_v37 = vpop.f32.mrf.mxu2 }
 0x313   :  { %v770_v38 = vadd.f32 %v769_v37, %v704_v20 }
 0x315   :  { %v807_v42 = vadd.f32 %v1715_v8, %v770_v38  ;;  %v725_v6 = vpop.f32.mrf.mxu1 }
 0x317   :  { %v1763_v39 = vsel %vm818_vm1, %v807_v42, -1e+30 }
 0x318   :  { %849 = vmax.xlane.f32.xlu1 %v1763_v39 }
 0x31a   :  { %v772_v1 = vpop.f32.mrf.mxu2 }
 0x31b   :  { %v773_v40 = vadd.f32 %v772_v1, %v707_v34 }
 0x31d   :  { %v808_v11 = vadd.f32 %v1715_v8, %v773_v40  ;;  %v728_v33 = vpop.f32.mrf.mxu1 }
 0x31f   :  { %v1769_v14 = vsel %vm818_vm1, %v808_v11, -1e+30 }
 0x320   :  { %851 = vmax.xlane.f32.xlu2 %v1769_v14 }
 0x322   :  { %v775_v44 = vpop.f32.mrf.mxu2 }
 0x323   :  { %v776_v50 = vadd.f32 %v775_v44, %v710_v43 }
 0x325   :  { %v809_v45 = vadd.f32 %v1715_v8, %v776_v50 }
 0x327   :  { %v1775_v53 = vsel %vm818_vm1, %v809_v45, -1e+30 }
 0x328   :  { %853 = vmax.xlane.f32.xlu0 %v1775_v53 }
 0x32a   :  { %v778_v55 = vpop.f32.mrf.mxu2 }
 0x32b   :  { %v779_v29 = vadd.f32 %v778_v55, %v713_v48 }
 0x32d   :  { %v810_v57 = vadd.f32 %v1715_v8, %v779_v29 }
 0x32f   :  { %v1781_v49 = vsel %vm818_vm1, %v810_v57, -1e+30 }
 0x330   :  { %855 = vmax.xlane.f32.xlu1 %v1781_v49 }
 0x332   :  { %v781_v23 = vpop.f32.mrf.mxu2 }
 0x333   :  { %v782_v0 = vadd.f32 %v781_v23, %v716_v46 }
 0x335   :  { %v811_v12 = vadd.f32 %v1715_v8, %v782_v0 }
 0x337   :  { %v1787_v54 = vsel %vm818_vm1, %v811_v12, -1e+30 }
 0x338   :  { %857 = vmax.xlane.f32.xlu2 %v1787_v54 }
 0x33a   :  { %v784_v47 = vpop.f32.mrf.mxu2 }
 0x33b   :  { %v785_v17 = vadd.f32 %v784_v47, %v719_v24 }
 0x33d   :  { %v812_v7 = vadd.f32 %v1715_v8, %v785_v17 }
 0x33f   :  { %v1793_v2 = vsel %vm818_vm1, %v812_v7, -1e+30 }
 0x340   :  { %859 = vmax.xlane.f32.xlu0 %v1793_v2 }
 0x342   :  { %v787_v18 = vpop.f32.mrf.mxu2 }
 0x343   :  { %v788_v62 = vadd.f32 %v787_v18, %v722_v56 }
 0x345   :  { %v813_v4 = vadd.f32 %v1715_v8, %v788_v62 }
 0x347   :  { %v1799_v63 = vsel %vm818_vm1, %v813_v4, -1e+30 }
 0x348   :  { %861 = vmax.xlane.f32.xlu1 %v1799_v63 }
 0x34a   :  { %v790_v9 = vpop.f32.mrf.mxu2 }
 0x34b   :  { %v791_v13 = vadd.f32 %v790_v9, %v725_v6 }
 0x34d   :  { %v814_v51 = vadd.f32 %v1715_v8, %v791_v13 }
 0x34f   :  { %v1805_v15 = vsel %vm818_vm1, %v814_v51, -1e+30 }
 0x350   :  { %863 = vmax.xlane.f32.xlu2 %v1805_v15 }
 0x352   :  { %v793_v41 = vpop.f32.mrf.mxu2 }
 0x353   :  { %v794_v59 = vadd.f32 %v793_v41, %v728_v33  ;;  %v836_v10 = vpop.xlane.xlu1 %835 }
 0x354   :  { %v1809_v3 = vsub.f32 %v1721_v28, %v836_v10 }
 0x355   :  { %v815_v60 = vadd.f32 %v1715_v8, %v794_v59 }
 0x356   :  { %v883_v21 = vmul.f32 1.442695, %v1809_v3 }
 0x357   :  { %v1815_v61 = vsel %vm818_vm1, %v815_v60, -1e+30 }
 0x358   :  { %1080 = vpow2.f32 %v883_v21  ;;  %865 = vmax.xlane.f32.xlu0 %v1815_v61 }
 0x35b   :  { %v838_v5 = vpop.xlane.xlu2 %837 }
 0x35c   :  { %v1819_v20 = vsub.f32 %v1727_v16, %v838_v5 }
 0x35e   :  { %v1081_v22 = vpop.eup %1080  ;;  %v885_v25 = vmul.f32 1.442695, %v1819_v20 }
 0x35f   :  { %915 = vadd.xlane.f32.xlu1 %v1081_v22 }
 0x360   :  { %1082 = vpow2.f32 %v885_v25 }
 0x363   :  { %v840_v28 = vpop.xlane.xlu0 %839 }
 0x364   :  { %v1823_v8 = vsub.f32 %v1733_v52, %v840_v28 }
 0x366   :  { %v1083_v26 = vpop.eup %1082  ;;  %v887_v58 = vmul.f32 1.442695, %v1823_v8 }
 0x367   :  { %917 = vadd.xlane.f32.xlu2 %v1083_v26 }
 0x368   :  { %1084 = vpow2.f32 %v887_v58 }
 0x36b   :  { %v842_v31 = vpop.xlane.xlu2 %841 }
 0x36c   :  { %v1827_v32 = vsub.f32 %v1739_v30, %v842_v31 }
 0x36e   :  { %v1085_v16 = vpop.eup %1084  ;;  %v889_v34 = vmul.f32 1.442695, %v1827_v32 }
 0x36f   :  { %919 = vadd.xlane.f32.xlu0 %v1085_v16 }
 0x370   :  { %1086 = vpow2.f32 %v889_v34 }
 0x373   :  { %v844_v35 = vpop.xlane.xlu1 %843 }
 0x374   :  { %v1831_v37 = vsub.f32 %v1745_v19, %v844_v35 }
 0x376   :  { %v1087_v52 = vpop.eup %1086  ;;  %v891_v38 = vmul.f32 1.442695, %v1831_v37 }
 0x377   :  { %921 = vadd.xlane.f32.xlu1 %v1087_v52 }
 0x378   :  { %1088 = vpow2.f32 %v891_v38 }
 0x37b   :  { %v846_v42 = vpop.xlane.xlu2 %845 }
 0x37c   :  { %v1835_v43 = vsub.f32 %v1751_v27, %v846_v42 }
 0x37e   :  { %v1089_v30 = vpop.eup %1088  ;;  %v893_v1 = vmul.f32 1.442695, %v1835_v43 }
 0x37f   :  { %923 = vadd.xlane.f32.xlu2 %v1089_v30 }
 0x380   :  { %1090 = vpow2.f32 %v893_v1 }
 0x383   :  { %v848_v40 = vpop.xlane.xlu0 %847 }
 0x384   :  { %v1839_v11 = vsub.f32 %v1757_v36, %v848_v40 }
 0x386   :  { %v1091_v19 = vpop.eup %1090  ;;  %v895_v48 = vmul.f32 1.442695, %v1839_v11 }
 0x387   :  { %925 = vadd.xlane.f32.xlu0 %v1091_v19 }
 0x388   :  { %1092 = vpow2.f32 %v895_v48 }
 0x38b   :  { %v850_v44 = vpop.xlane.xlu1 %849 }
 0x38c   :  { %v1843_v50 = vsub.f32 %v1763_v39, %v850_v44 }
 0x38e   :  { %v1093_v27 = vpop.eup %1092  ;;  %v897_v45 = vmul.f32 1.442695, %v1843_v50 }
 0x38f   :  { %927 = vadd.xlane.f32.xlu1 %v1093_v27 }
 0x390   :  { %1094 = vpow2.f32 %v897_v45 }
 0x393   :  { %v852_v46 = vpop.xlane.xlu2 %851 }
 0x394   :  { %v1847_v55 = vsub.f32 %v1769_v14, %v852_v46 }
 0x396   :  { %v1095_v36 = vpop.eup %1094  ;;  %v899_v29 = vmul.f32 1.442695, %v1847_v55 }
 0x397   :  { %929 = vadd.xlane.f32.xlu2 %v1095_v36 }
 0x398   :  { %1096 = vpow2.f32 %v899_v29 }
 0x39b   :  { %v854_v57 = vpop.xlane.xlu0 %853 }
 0x39c   :  { %v1851_v23 = vsub.f32 %v1775_v53, %v854_v57 }
 0x39e   :  { %v1097_v39 = vpop.eup %1096  ;;  %v901_v0 = vmul.f32 1.442695, %v1851_v23 }
 0x39f   :  { %931 = vadd.xlane.f32.xlu0 %v1097_v39 }
 0x3a0   :  { %1098 = vpow2.f32 %v901_v0 }
 0x3a3   :  { %v856_v24 = vpop.xlane.xlu1 %855 }
 0x3a4   :  { %v1855_v12 = vsub.f32 %v1781_v49, %v856_v24 }
 0x3a6   :  { %v1099_v14 = vpop.eup %1098  ;;  %v903_v47 = vmul.f32 1.442695, %v1855_v12 }
 0x3a7   :  { %933 = vadd.xlane.f32.xlu1 %v1099_v14 }
 0x3a8   :  { %1100 = vpow2.f32 %v903_v47 }
 0x3ab   :  { %v858_v17 = vpop.xlane.xlu2 %857 }
 0x3ac   :  { %v1859_v7 = vsub.f32 %v1787_v54, %v858_v17 }
 0x3ae   :  { %v1101_v53 = vpop.eup %1100  ;;  %v905_v56 = vmul.f32 1.442695, %v1859_v7 }
 0x3af   :  { %935 = vadd.xlane.f32.xlu2 %v1101_v53 }
 0x3b0   :  { %1102 = vpow2.f32 %v905_v56 }
 0x3b3   :  { %v860_v18 = vpop.xlane.xlu0 %859 }
 0x3b4   :  { %v1863_v62 = vsub.f32 %v1793_v2, %v860_v18 }
 0x3b6   :  { %v1103_v49 = vpop.eup %1102  ;;  %v907_v4 = vmul.f32 1.442695, %v1863_v62 }
 0x3b7   :  { %937 = vadd.xlane.f32.xlu0 %v1103_v49 }
 0x3b8   :  { %1104 = vpow2.f32 %v907_v4 }
 0x3bb   :  { %v862_v6 = vpop.xlane.xlu1 %861 }
 0x3bc   :  { %v1867_v9 = vsub.f32 %v1799_v63, %v862_v6 }
 0x3be   :  { %v1105_v54 = vpop.eup %1104  ;;  %v909_v13 = vmul.f32 1.442695, %v1867_v9 }
 0x3bf   :  { %939 = vadd.xlane.f32.xlu1 %v1105_v54 }
 0x3c0   :  { %1106 = vpow2.f32 %v909_v13 }
 0x3c3   :  { %v864_v51 = vpop.xlane.xlu2 %863 }
 0x3c4   :  { %v1871_v33 = vsub.f32 %v1805_v15, %v864_v51 }
 0x3c6   :  { %v1107_v2 = vpop.eup %1106  ;;  %v911_v41 = vmul.f32 1.442695, %v1871_v33 }
 0x3c7   :  { %941 = vadd.xlane.f32.xlu2 %v1107_v2 }
 0x3c8   :  { %1108 = vpow2.f32 %v911_v41 }
 0x3cb   :  { %v866_v59 = vpop.xlane.xlu0 %865 }
 0x3cc   :  { %v1875_v10 = vsub.f32 %v1815_v61, %v866_v59 }
 0x3ce   :  { %v1109_v63 = vpop.eup %1108  ;;  %v913_v60 = vmul.f32 1.442695, %v1875_v10 }
 0x3cf   :  { %943 = vadd.xlane.f32.xlu0 %v1109_v63 }
 0x3d0   :  { %1110 = vpow2.f32 %v913_v60 }
 0x3d2   :  { %v916_v21 = vpop.xlane.xlu1 %915 }
 0x3d3   :  { %1112 = vlog2.f32 %v916_v21 }
 0x3d6   :  { %v1111_v5 = vpop.eup %1110 }
 0x3d7   :  { %945 = vadd.xlane.f32.xlu1 %v1111_v5 }
 0x3d9   :  { %v1113_v15 = vpop.eup %1112 }
 0x3da   :  { %v948_v22 = vmul.f32 0.6931472, %v1113_v15  ;;  %v918_v25 = vpop.xlane.xlu2 %917 }
 0x3db   :  { %1114 = vlog2.f32 %v918_v25 }
 0x3dc   :  { %v979_v28 = vsub.f32 %v1809_v3, %v948_v22 }
 0x3de   :  { %995 = vst [vmem:[#allocation7] sm:$0xff] %v979_v28 }
 0x3e1   :  { %v1115_v26 = vpop.eup %1114 }
 0x3e2   :  { %v950_v58 = vmul.f32 0.6931472, %v1115_v26  ;;  %v920_v61 = vpop.xlane.xlu0 %919 }
 0x3e3   :  { %1116 = vlog2.f32 %v920_v61 }
 0x3e4   :  { %v980_v31 = vsub.f32 %v1819_v20, %v950_v58 }
 0x3e6   :  { %996 = vst [vmem:[#allocation7 + $0x8] sm:$0xff] %v980_v31 }
 0x3e9   :  { %v1117_v16 = vpop.eup %1116 }
 0x3ea   :  { %v952_v34 = vmul.f32 0.6931472, %v1117_v16  ;;  %v922_v35 = vpop.xlane.xlu1 %921 }
 0x3eb   :  { %1118 = vlog2.f32 %v922_v35 }
 0x3ec   :  { %v981_v52 = vsub.f32 %v1823_v8, %v952_v34 }
 0x3ee   :  { %997 = vst [vmem:[#allocation7 + $0x10] sm:$0xff] %v981_v52 }
 0x3f1   :  { %v1119_v38 = vpop.eup %1118 }
 0x3f2   :  { %v954_v42 = vmul.f32 0.6931472, %v1119_v38  ;;  %v924_v30 = vpop.xlane.xlu2 %923 }
 0x3f3   :  { %1120 = vlog2.f32 %v924_v30 }
 0x3f4   :  { %v982_v3 = vsub.f32 %v1827_v32, %v954_v42 }
 0x3f6   :  { %998 = vst [vmem:[#allocation7 + $0x18] sm:$0xff] %v982_v3 }
 0x3f9   :  { %v1121_v1 = vpop.eup %1120 }
 0x3fa   :  { %v956_v40 = vmul.f32 0.6931472, %v1121_v1  ;;  %v926_v19 = vpop.xlane.xlu0 %925 }
 0x3fb   :  { %1122 = vlog2.f32 %v926_v19 }
 0x3fc   :  { %v983_v20 = vsub.f32 %v1831_v37, %v956_v40 }
 0x3fe   :  { %999 = vst [vmem:[#allocation7 + $0x20] sm:$0xff] %v983_v20 }
 0x401   :  { %v1123_v48 = vpop.eup %1122 }
 0x402   :  { %v958_v44 = vmul.f32 0.6931472, %v1123_v48  ;;  %v928_v27 = vpop.xlane.xlu1 %927 }
 0x403   :  { %1124 = vlog2.f32 %v928_v27 }
 0x404   :  { %v984_v8 = vsub.f32 %v1835_v43, %v958_v44 }
 0x406   :  { %1000 = vst [vmem:[#allocation7 + $0x28] sm:$0xff] %v984_v8 }
 0x409   :  { %v1125_v45 = vpop.eup %1124 }
 0x40a   :  { %v960_v46 = vmul.f32 0.6931472, %v1125_v45  ;;  %v930_v36 = vpop.xlane.xlu2 %929 }
 0x40b   :  { %1126 = vlog2.f32 %v930_v36 }
 0x40c   :  { %v985_v32 = vsub.f32 %v1839_v11, %v960_v46 }
 0x40e   :  { %1001 = vst [vmem:[#allocation7 + $0x30] sm:$0xff] %v985_v32 }
 0x411   :  { %v1127_v29 = vpop.eup %1126 }
 0x412   :  { %v962_v57 = vmul.f32 0.6931472, %v1127_v29  ;;  %v932_v39 = vpop.xlane.xlu0 %931 }
 0x413   :  { %1128 = vlog2.f32 %v932_v39 }
 0x414   :  { %v986_v37 = vsub.f32 %v1843_v50, %v962_v57 }
 0x416   :  { %1002 = vst [vmem:[#allocation7 + $0x38] sm:$0xff] %v986_v37 }
 0x419   :  { %v1129_v0 = vpop.eup %1128 }
 0x41a   :  { %v964_v24 = vmul.f32 0.6931472, %v1129_v0  ;;  %v934_v14 = vpop.xlane.xlu1 %933 }
 0x41b   :  { %1130 = vlog2.f32 %v934_v14 }
 0x41c   :  { %v987_v43 = vsub.f32 %v1847_v55, %v964_v24 }
 0x41e   :  { %1003 = vst [vmem:[#allocation7 + $0x40] sm:$0xff] %v987_v43 }
 0x421   :  { %v1131_v47 = vpop.eup %1130 }
 0x422   :  { %v966_v17 = vmul.f32 0.6931472, %v1131_v47  ;;  %v936_v53 = vpop.xlane.xlu2 %935 }
 0x423   :  { %1132 = vlog2.f32 %v936_v53 }
 0x424   :  { %v988_v11 = vsub.f32 %v1851_v23, %v966_v17 }
 0x426   :  { %1004 = vst [vmem:[#allocation7 + $0x48] sm:$0xff] %v988_v11 }
 0x429   :  { %v1133_v56 = vpop.eup %1132 }
 0x42a   :  { %v968_v18 = vmul.f32 0.6931472, %v1133_v56  ;;  %v938_v49 = vpop.xlane.xlu0 %937 }
 0x42b   :  { %1134 = vlog2.f32 %v938_v49 }
 0x42c   :  { %v989_v50 = vsub.f32 %v1855_v12, %v968_v18 }
 0x42e   :  { %1005 = vst [vmem:[#allocation7 + $0x50] sm:$0xff] %v989_v50 }
 0x431   :  { %v1135_v4 = vpop.eup %1134 }
 0x432   :  { %v970_v6 = vmul.f32 0.6931472, %v1135_v4  ;;  %v940_v54 = vpop.xlane.xlu1 %939 }
 0x433   :  { %1136 = vlog2.f32 %v940_v54 }
 0x434   :  { %v990_v55 = vsub.f32 %v1859_v7, %v970_v6 }
 0x436   :  { %1006 = vst [vmem:[#allocation7 + $0x58] sm:$0xff] %v990_v55 }
 0x439   :  { %v1137_v13 = vpop.eup %1136 }
 0x43a   :  { %v972_v51 = vmul.f32 0.6931472, %v1137_v13  ;;  %v942_v2 = vpop.xlane.xlu2 %941 }
 0x43b   :  { %1138 = vlog2.f32 %v942_v2 }
 0x43c   :  { %v991_v23 = vsub.f32 %v1863_v62, %v972_v51 }
 0x43e   :  { %1007 = vst [vmem:[#allocation7 + $0x60] sm:$0xff] %v991_v23 }
 0x441   :  { %v1139_v41 = vpop.eup %1138 }
 0x442   :  { %v974_v59 = vmul.f32 0.6931472, %v1139_v41  ;;  %v944_v63 = vpop.xlane.xlu0 %943 }
 0x443   :  { %1140 = vlog2.f32 %v944_v63 }
 0x444   :  { %v992_v12 = vsub.f32 %v1867_v9, %v974_v59 }
 0x446   :  { %1008 = vst [vmem:[#allocation7 + $0x68] sm:$0xff] %v992_v12 }
 0x449   :  { %v1141_v60 = vpop.eup %1140 }
 0x44a   :  { %v976_v21 = vmul.f32 0.6931472, %v1141_v60  ;;  %v946_v5 = vpop.xlane.xlu1 %945 }
 0x44b   :  { %1142 = vlog2.f32 %v946_v5 }
 0x44c   :  { %v993_v7 = vsub.f32 %v1871_v33, %v976_v21 }
 0x44e   :  { %1009 = vst [vmem:[#allocation7 + $0x70] sm:$0xff] %v993_v7 }
 0x451   :  { %v1143_v15 = vpop.eup %1142 }
 0x452   :  { %v978_v62 = vmul.f32 0.6931472, %v1143_v15 }
 0x454   :  { %v994_v22 = vsub.f32 %v1875_v10, %v978_v62 }
 0x456   :  { %1010 = vst [vmem:[#allocation7 + $0x78] sm:$0xff] %v994_v22 }
 0x457   :  { %1023 = dma.vmem_to_hbm [thread:$0]  %s1016_s14, 2048, %s1018_s19, [#allocation4], %s1223_s17, %s1223_s17, %s1224_s18  }
 0x458   :  { %1220 = dma.done.wait [#allocation4], 2048  }
 0x459   :  { %1221 = vsyncadd [#allocation4], 4294965248 }
 0x45a   :  { %1028 = vsyncpa [#allocation3], 1 }
 0x45b   :  { %1029 = vsyncpa [#allocation6], 1 }
 0x45c   :  { %1030 = vsyncpa [#allocation4], 1 }

</bundles_post_ra>
